<compile_context>
chip_gen: v5e
topology: v5e:2x2
jax: 0.10.0
libtpu: 0.0.40
codegen_flags: <defaults>
</compile_context>

<pallas_src>
import math
import jax
import jax.numpy as jnp
from jax.experimental import pallas as pl
from jax.experimental.pallas import tpu as pltpu

VOCAB = 128
MAX_POS = 16
TYPE_VOCAB = 2
H = 128            # hidden size
NH = 2             # attention heads
HD = H // NH       # head dim
FF = 256           # intermediate (FFN) size
NLAYERS = 2
NCLASSES = 3
NC_PAD = 128       # lane-padded logits slab (lane-dense stores)
LN_EPS = 1e-12
ATTN_SCALE = 1.0 / math.sqrt(HD)


# ------------------------------- kernel helpers -------------------------------

def _layer_norm(x, gamma, beta):
    # f32 statistics on the VPU/EUP (kept f32 on all generations, incl. v5e).
    mu = jnp.mean(x, axis=-1, keepdims=True)
    var = jnp.mean((x - mu) ** 2, axis=-1, keepdims=True)
    inv = jax.lax.rsqrt(var + LN_EPS)
    return (x - mu) * inv * gamma + beta


# ------------------------------- fused Pallas kernel -------------------------------

def fused_bert_kernel(x_ref, mask_ref, embg_ref, embb_ref,
                      wqkv_ref, bqkv_ref, wo_ref, bo_ref, g1_ref, be1_ref,
                      w1_ref, b1_ref, w2_ref, b2_ref, g2_ref, be2_ref,
                      wp_ref, bp_ref, wout_ref, bout_ref, o_ref):
    # One batch element per grid step ("parallel" -> megacore sharding on v7x).
    S = x_ref.shape[1]
    m = mask_ref[0]                                          # (1, S) additive key mask
    x = _layer_norm(x_ref[0], embg_ref[...], embb_ref[...])  # (S, H) f32

    def mm(a_f32, w_bf16, b_f32):
        # bf16 MXU operands, f32 accumulate, f32 bias add.
        return jnp.dot(a_f32.astype(jnp.bfloat16), w_bf16,
                       preferred_element_type=jnp.float32) + b_f32

    for l in range(NLAYERS):                                 # static unroll (2 layers)
        # ---- fused Q/K/V projection (head axis = dot_general batch dim) ----
        xb = jnp.broadcast_to(x.astype(jnp.bfloat16), (3 * NH, S, H))
        # (3NH, S, H) @ (3NH, H, HD) -> (3NH, S, HD), f32 accumulate
        qkv = jax.lax.dot_general(
            xb, wqkv_ref[l], (((2,), (1,)), ((0,), (0,))),
            preferred_element_type=jnp.float32) + bqkv_ref[l]
        qh = qkv[0:NH]                                       # (NH, S, HD)
        kh = qkv[NH:2 * NH]
        vh = qkv[2 * NH:3 * NH]

        # scores: (NH, S, HD) x (NH, S, HD) -> (NH, S, S)
        s = jax.lax.dot_general(qh.astype(jnp.bfloat16), kh.astype(jnp.bfloat16),
                                (((2,), (2,)), ((0,), (0,))),
                                preferred_element_type=jnp.float32)
        s = s * ATTN_SCALE + m                               # additive mask over keys
        s = s - jnp.max(s, axis=-1, keepdims=True)
        p = jnp.exp(s)
        p = p * pl.reciprocal(jnp.sum(p, axis=-1, keepdims=True), approx=True)

        # context: (NH, S, S) x (NH, S, HD) -> (NH, S, HD)
        ctx = jax.lax.dot_general(p.astype(jnp.bfloat16), vh.astype(jnp.bfloat16),
                                  (((2,), (1,)), ((0,), (0,))),
                                  preferred_element_type=jnp.float32)

        # output projection: sum over heads of (S, HD) @ (HD, H) -> (S, H)
        attn = jnp.sum(
            jax.lax.dot_general(ctx.astype(jnp.bfloat16), wo_ref[l],
                                (((2,), (1,)), ((0,), (0,))),
                                preferred_element_type=jnp.float32),
            axis=0) + bo_ref[l]

        h1 = _layer_norm(x + attn, g1_ref[l], be1_ref[l])

        # ---- feed-forward ----
        ff = mm(h1, w1_ref[l], b1_ref[l])                    # (S, FF) f32
        # TODO(synk): HF BERT uses exact erf GELU; tanh approximation used here.
        ff = jax.nn.gelu(ff, approximate=True)
        ff = mm(ff, w2_ref[l], b2_ref[l])                    # (S, H) f32
        x = _layer_norm(h1 + ff, g2_ref[l], be2_ref[l])

    # ---- pooler + classifier epilogue on the [CLS] row already in VMEM ----
    cls = x[0:1, :]                                          # (1, H) f32
    pooled = jnp.tanh(mm(cls, wp_ref[...], bp_ref[...]))     # (1, H) f32
    # Dropout(p=0.3) is identity at inference time.
    # TODO(synk): training-mode dropout would use pltpu.prng_seed + pltpu.stateful_bernoulli.
    o_ref[0] = mm(pooled, wout_ref[...], bout_ref[...])      # (1, NC_PAD) lane-dense store


# ------------------------------- pallas_call wrapper -------------------------------

def fused_forward(x_emb, add_mask, pk):
    B, S, _ = x_emb.shape

    def whole(arr):
        # Full-array block, constant block index -> DMA'd once, VMEM-resident.
        return pl.BlockSpec(arr.shape, lambda b, _n=arr.ndim: (0,) * _n)

    weight_names = ['emb_ln_g', 'emb_ln_b',
                    'wqkv', 'bqkv', 'wo', 'bo', 'ln1_g', 'ln1_b',
                    'w1', 'b1', 'w2', 'b2', 'ln2_g', 'ln2_b',
                    'pooler_w', 'pooler_b', 'out_w', 'out_b']
    weights = [pk[n] for n in weight_names]

    in_specs = ([pl.BlockSpec((1, S, H), lambda b: (b, 0, 0)),    # activations
                 pl.BlockSpec((1, 1, S), lambda b: (b, 0, 0))]    # additive mask
                + [whole(w) for w in weights])

    logits_pad = pl.pallas_call(
        fused_bert_kernel,
        out_shape=jax.ShapeDtypeStruct((B, 1, NC_PAD), jnp.float32),
        grid_spec=pltpu.PrefetchScalarGridSpec(
            num_scalar_prefetch=0, grid=(B,),
            in_specs=in_specs,
            out_specs=pl.BlockSpec((1, 1, NC_PAD), lambda b: (b, 0, 0))),
        compiler_params=pltpu.CompilerParams(
            dimension_semantics=("parallel",)),
    )(x_emb, add_mask, *weights)
    return logits_pad[:, 0, :NCLASSES]


# ------------------------------- parameters -------------------------------

def init_params(key):
    def nrm(k, shape, scale=0.02):
        return (scale * jax.random.normal(k, shape)).astype(jnp.float32)

    keys = iter(jax.random.split(key, 64))
    params = {
        'word_emb': nrm(next(keys), (VOCAB, H)),
        'pos_emb':  nrm(next(keys), (MAX_POS, H)),
        'type_emb': nrm(next(keys), (TYPE_VOCAB, H)),
        'emb_ln_g': jnp.ones((1, H), jnp.float32),
        'emb_ln_b': jnp.zeros((1, H), jnp.float32),
        'layers': [],
        'pooler_w': nrm(next(keys), (H, H)),
        'pooler_b': jnp.zeros((1, H), jnp.float32),
        'out_w': nrm(next(keys), (H, NCLASSES)),
        'out_b': jnp.zeros((1, NCLASSES), jnp.float32),
    }
    for _ in range(NLAYERS):
        params['layers'].append({
            'wq': nrm(next(keys), (H, H)), 'bq': jnp.zeros((1, H), jnp.float32),
            'wk': nrm(next(keys), (H, H)), 'bk': jnp.zeros((1, H), jnp.float32),
            'wv': nrm(next(keys), (H, H)), 'bv': jnp.zeros((1, H), jnp.float32),
            'wo': nrm(next(keys), (H, H)), 'bo': jnp.zeros((1, H), jnp.float32),
            'ln1_g': jnp.ones((1, H), jnp.float32), 'ln1_b': jnp.zeros((1, H), jnp.float32),
            'w1': nrm(next(keys), (H, FF)), 'b1': jnp.zeros((1, FF), jnp.float32),
            'w2': nrm(next(keys), (FF, H)), 'b2': jnp.zeros((1, H), jnp.float32),
            'ln2_g': jnp.ones((1, H), jnp.float32), 'ln2_b': jnp.zeros((1, H), jnp.float32),
        })
    return params


def pack_params(p):
    """Stack per-layer weights along [NLAYERS,...], pre-split attention weights per head,
    fuse Q/K/V along the head-batch axis, cast matmul operands to bf16 (biases / LN params
    stay f32), lane-pad the classifier."""
    bf = jnp.bfloat16
    L = p['layers']

    def stack(fn, dtype):
        return jnp.stack([fn(lp) for lp in L]).astype(dtype)

    def head_w(lp, name):   # (H, H) -> (NH, H, HD); head h owns output cols [h*HD:(h+1)*HD]
        return lp[name].reshape(H, NH, HD).transpose(1, 0, 2)

    def head_b(lp, name):   # (1, H) -> (NH, 1, HD)
        return lp[name].reshape(1, NH, HD).transpose(1, 0, 2)

    # Fused QKV: batch axis = [q heads | k heads | v heads]  -> (NLAYERS, 3*NH, H, HD)
    wqkv = stack(lambda lp: jnp.concatenate(
        [head_w(lp, 'wq'), head_w(lp, 'wk'), head_w(lp, 'wv')], axis=0), bf)
    bqkv = stack(lambda lp: jnp.concatenate(
        [head_b(lp, 'bq'), head_b(lp, 'bk'), head_b(lp, 'bv')], axis=0), jnp.float32)

    out_w = jnp.zeros((H, NC_PAD), bf).at[:, :NCLASSES].set(p['out_w'].astype(bf))
    out_b = jnp.zeros((1, NC_PAD), jnp.float32).at[:, :NCLASSES].set(p['out_b'])

    return {
        'emb_ln_g': p['emb_ln_g'], 'emb_ln_b': p['emb_ln_b'],
        'wqkv': wqkv, 'bqkv': bqkv,
        'wo': stack(lambda lp: lp['wo'].reshape(NH, HD, H), bf),          # (NLAYERS,NH,HD,H)
        'bo': stack(lambda lp: lp['bo'], jnp.float32),
        'ln1_g': stack(lambda lp: lp['ln1_g'], jnp.float32),
        'ln1_b': stack(lambda lp: lp['ln1_b'], jnp.float32),
        'w1': stack(lambda lp: lp['w1'], bf), 'b1': stack(lambda lp: lp['b1'], jnp.float32),
        'w2': stack(lambda lp: lp['w2'], bf), 'b2': stack(lambda lp: lp['b2'], jnp.float32),
        'ln2_g': stack(lambda lp: lp['ln2_g'], jnp.float32),
        'ln2_b': stack(lambda lp: lp['ln2_b'], jnp.float32),
        'pooler_w': p['pooler_w'].astype(bf), 'pooler_b': p['pooler_b'],
        'out_w': out_w, 'out_b': out_b,
    }


# ------------------------------- forward -------------------------------

@jax.jit
def sentiment_classifier_forward(params, input_ids, attention_mask, token_type_ids):
    B, S = input_ids.shape
    pk = pack_params(params)
    # Embedding gathers are glue (plain JAX); everything else runs in the fused kernel.
    x = (params['word_emb'][input_ids]
         + params['pos_emb'][:S][None, :, :]
         + params['type_emb'][token_type_ids]).astype(jnp.float32)
    add_mask = ((1.0 - attention_mask.astype(jnp.float32)) * -10000.0)[:, None, :]  # (B,1,S)
    return fused_forward(x, add_mask, pk)      # (B, NCLASSES)


if __name__ == "__main__":
    key = jax.random.PRNGKey(0)
    k_params, k_ids = jax.random.split(key)

    B, S = 2, 8
    params = init_params(k_params)
    input_ids = jax.random.randint(k_ids, (B, S), 0, VOCAB, dtype=jnp.int32)
    attention_mask = jnp.array([[1, 1, 1, 1, 1, 1, 1, 1],
                                [1, 1, 1, 1, 1, 1, 0, 0]], dtype=jnp.int32)
    token_type_ids = jnp.zeros((B, S), dtype=jnp.int32)

    logits = sentiment_classifier_forward(params, input_ids, attention_mask, token_type_ids)
    logits = jax.block_until_ready(logits)
    assert logits.shape == (B, NCLASSES) and logits.dtype == jnp.float32
    print("KERNEL_OK")
</pallas_src>

<mosaic_0001>
module attributes {stable_mosaic.version = 11 : i64} {
  func.func @fused_bert_kernel(%arg0: i32, %arg1: memref<1x8x128xf32, #tpu.memory_space<vmem>>, %arg2: memref<1x1x8xf32, #tpu.memory_space<vmem>>, %arg3: memref<1x128xf32, #tpu.memory_space<vmem>>, %arg4: memref<1x128xf32, #tpu.memory_space<vmem>>, %arg5: memref<2x6x128x64xbf16, #tpu.memory_space<vmem>>, %arg6: memref<2x6x1x64xf32, #tpu.memory_space<vmem>>, %arg7: memref<2x2x64x128xbf16, #tpu.memory_space<vmem>>, %arg8: memref<2x1x128xf32, #tpu.memory_space<vmem>>, %arg9: memref<2x1x128xf32, #tpu.memory_space<vmem>>, %arg10: memref<2x1x128xf32, #tpu.memory_space<vmem>>, %arg11: memref<2x128x256xbf16, #tpu.memory_space<vmem>>, %arg12: memref<2x1x256xf32, #tpu.memory_space<vmem>>, %arg13: memref<2x256x128xbf16, #tpu.memory_space<vmem>>, %arg14: memref<2x1x128xf32, #tpu.memory_space<vmem>>, %arg15: memref<2x1x128xf32, #tpu.memory_space<vmem>>, %arg16: memref<2x1x128xf32, #tpu.memory_space<vmem>>, %arg17: memref<128x128xbf16, #tpu.memory_space<vmem>>, %arg18: memref<1x128xf32, #tpu.memory_space<vmem>>, %arg19: memref<128x128xbf16, #tpu.memory_space<vmem>>, %arg20: memref<1x128xf32, #tpu.memory_space<vmem>>, %arg21: memref<1x1x128xf32, #tpu.memory_space<vmem>>) attributes {dimension_semantics = [#tpu.dimension_semantics<parallel>], iteration_bounds = array<i64: 2>, scalar_prefetch = 0 : i64, scratch_operands = 0 : i64, tpu.core_type = #tpu.core_type<tc>, window_params = [{transform_indices = @transform_0, window_bounds = array<i64: 1, 8, 128>}, {transform_indices = @transform_1, window_bounds = array<i64: 1, 1, 8>}, {pipeline_mode = #tpu.pipeline_mode<synchronous>, transform_indices = @transform_2, window_bounds = array<i64: 1, 128>}, {pipeline_mode = #tpu.pipeline_mode<synchronous>, transform_indices = @transform_3, window_bounds = array<i64: 1, 128>}, {pipeline_mode = #tpu.pipeline_mode<synchronous>, transform_indices = @transform_4, window_bounds = array<i64: 2, 6, 128, 64>}, {pipeline_mode = #tpu.pipeline_mode<synchronous>, transform_indices = @transform_5, window_bounds = array<i64: 2, 6, 1, 64>}, {pipeline_mode = #tpu.pipeline_mode<synchronous>, transform_indices = @transform_6, window_bounds = array<i64: 2, 2, 64, 128>}, {pipeline_mode = #tpu.pipeline_mode<synchronous>, transform_indices = @transform_7, window_bounds = array<i64: 2, 1, 128>}, {pipeline_mode = #tpu.pipeline_mode<synchronous>, transform_indices = @transform_8, window_bounds = array<i64: 2, 1, 128>}, {pipeline_mode = #tpu.pipeline_mode<synchronous>, transform_indices = @transform_9, window_bounds = array<i64: 2, 1, 128>}, {pipeline_mode = #tpu.pipeline_mode<synchronous>, transform_indices = @transform_10, window_bounds = array<i64: 2, 128, 256>}, {pipeline_mode = #tpu.pipeline_mode<synchronous>, transform_indices = @transform_11, window_bounds = array<i64: 2, 1, 256>}, {pipeline_mode = #tpu.pipeline_mode<synchronous>, transform_indices = @transform_12, window_bounds = array<i64: 2, 256, 128>}, {pipeline_mode = #tpu.pipeline_mode<synchronous>, transform_indices = @transform_13, window_bounds = array<i64: 2, 1, 128>}, {pipeline_mode = #tpu.pipeline_mode<synchronous>, transform_indices = @transform_14, window_bounds = array<i64: 2, 1, 128>}, {pipeline_mode = #tpu.pipeline_mode<synchronous>, transform_indices = @transform_15, window_bounds = array<i64: 2, 1, 128>}, {pipeline_mode = #tpu.pipeline_mode<synchronous>, transform_indices = @transform_16, window_bounds = array<i64: 128, 128>}, {pipeline_mode = #tpu.pipeline_mode<synchronous>, transform_indices = @transform_17, window_bounds = array<i64: 1, 128>}, {pipeline_mode = #tpu.pipeline_mode<synchronous>, transform_indices = @transform_18, window_bounds = array<i64: 128, 128>}, {pipeline_mode = #tpu.pipeline_mode<synchronous>, transform_indices = @transform_19, window_bounds = array<i64: 1, 128>}, {transform_indices = @transform_20, window_bounds = array<i64: 1, 1, 128>}]} {
    %c0 = arith.constant 0 : index
    %c0_0 = arith.constant 0 : index
    %c0_1 = arith.constant 0 : index
    %0 = vector.load %arg2[%c0, %c0_0, %c0_1] : memref<1x1x8xf32, #tpu.memory_space<vmem>>, vector<1x1x8xf32>
    %1 = vector.shape_cast %0 : vector<1x1x8xf32> to vector<1x8xf32>
    %c0_2 = arith.constant 0 : index
    %c0_3 = arith.constant 0 : index
    %c0_4 = arith.constant 0 : index
    %2 = vector.load %arg1[%c0_2, %c0_3, %c0_4] : memref<1x8x128xf32, #tpu.memory_space<vmem>>, vector<1x8x128xf32>
    %3 = vector.shape_cast %2 : vector<1x8x128xf32> to vector<8x128xf32>
    %c0_5 = arith.constant 0 : index
    %c0_6 = arith.constant 0 : index
    %4 = vector.load %arg3[%c0_5, %c0_6] : memref<1x128xf32, #tpu.memory_space<vmem>>, vector<1x128xf32>
    %c0_7 = arith.constant 0 : index
    %c0_8 = arith.constant 0 : index
    %5 = vector.load %arg4[%c0_7, %c0_8] : memref<1x128xf32, #tpu.memory_space<vmem>>, vector<1x128xf32>
    %cst = arith.constant dense<0.000000e+00> : vector<8xf32>
    %6 = vector.multi_reduction <add>, %3, %cst [1] : vector<8x128xf32> to vector<8xf32>
    %7 = vector.shape_cast %6 : vector<8xf32> to vector<8x1xf32>
    %cst_9 = arith.constant 1.280000e+02 : f32
    %8 = vector.broadcast %cst_9 : f32 to vector<8x1xf32>
    %9 = arith.divf %7, %8 : vector<8x1xf32>
    %10 = vector.broadcast %9 : vector<8x1xf32> to vector<8x128xf32>
    %11 = arith.subf %3, %10 : vector<8x128xf32>
    %12 = arith.mulf %11, %11 : vector<8x128xf32>
    %cst_10 = arith.constant dense<0.000000e+00> : vector<8xf32>
    %13 = vector.multi_reduction <add>, %12, %cst_10 [1] : vector<8x128xf32> to vector<8xf32>
    %14 = vector.shape_cast %13 : vector<8xf32> to vector<8x1xf32>
    %cst_11 = arith.constant 1.280000e+02 : f32
    %15 = vector.broadcast %cst_11 : f32 to vector<8x1xf32>
    %16 = arith.divf %14, %15 : vector<8x1xf32>
    %cst_12 = arith.constant 9.99999996E-13 : f32
    %17 = vector.broadcast %cst_12 : f32 to vector<8x1xf32>
    %18 = arith.addf %16, %17 : vector<8x1xf32>
    %19 = math.rsqrt %18 : vector<8x1xf32>
    %20 = vector.broadcast %9 : vector<8x1xf32> to vector<8x128xf32>
    %21 = arith.subf %3, %20 : vector<8x128xf32>
    %22 = vector.broadcast %19 : vector<8x1xf32> to vector<8x128xf32>
    %23 = arith.mulf %21, %22 : vector<8x128xf32>
    %24 = vector.broadcast %4 : vector<1x128xf32> to vector<8x128xf32>
    %25 = arith.mulf %23, %24 : vector<8x128xf32>
    %26 = vector.broadcast %5 : vector<1x128xf32> to vector<8x128xf32>
    %27 = arith.addf %25, %26 : vector<8x128xf32>
    %28 = arith.truncf %27 : vector<8x128xf32> to vector<8x128xbf16>
    %29 = vector.shape_cast %28 : vector<8x128xbf16> to vector<1x8x128xbf16>
    %30 = vector.broadcast %29 : vector<1x8x128xbf16> to vector<6x8x128xbf16>
    %c0_13 = arith.constant 0 : index
    %c0_14 = arith.constant 0 : index
    %c0_15 = arith.constant 0 : index
    %c0_16 = arith.constant 0 : index
    %31 = vector.load %arg5[%c0_13, %c0_14, %c0_15, %c0_16] : memref<2x6x128x64xbf16, #tpu.memory_space<vmem>>, vector<1x6x128x64xbf16>
    %32 = vector.shape_cast %31 : vector<1x6x128x64xbf16> to vector<6x128x64xbf16>
    %cst_17 = arith.constant dense<0.000000e+00> : vector<6x8x64xf32>
    %33 = tpu.matmul %30, %32, %cst_17 {dimension_numbers = #tpu.dot_dimension_numbers<[2], [1], [1], [2], [0, 0, 0, 1, 1, 2], [0], [0]>} : vector<6x8x128xbf16>, vector<6x128x64xbf16>, vector<6x8x64xf32> -> vector<6x8x64xf32>
    %c0_18 = arith.constant 0 : index
    %c0_19 = arith.constant 0 : index
    %c0_20 = arith.constant 0 : index
    %c0_21 = arith.constant 0 : index
    %34 = vector.load %arg6[%c0_18, %c0_19, %c0_20, %c0_21] : memref<2x6x1x64xf32, #tpu.memory_space<vmem>>, vector<1x6x1x64xf32>
    %35 = vector.shape_cast %34 : vector<1x6x1x64xf32> to vector<6x1x64xf32>
    %36 = vector.broadcast %35 : vector<6x1x64xf32> to vector<6x8x64xf32>
    %37 = arith.addf %33, %36 : vector<6x8x64xf32>
    %38 = vector.extract_strided_slice %37 {offsets = [0, 0, 0], sizes = [2, 8, 64], strides = [1, 1, 1]} : vector<6x8x64xf32> to vector<2x8x64xf32>
    %39 = vector.extract_strided_slice %37 {offsets = [2, 0, 0], sizes = [2, 8, 64], strides = [1, 1, 1]} : vector<6x8x64xf32> to vector<2x8x64xf32>
    %40 = vector.extract_strided_slice %37 {offsets = [4, 0, 0], sizes = [2, 8, 64], strides = [1, 1, 1]} : vector<6x8x64xf32> to vector<2x8x64xf32>
    %41 = arith.truncf %38 : vector<2x8x64xf32> to vector<2x8x64xbf16>
    %42 = arith.truncf %39 : vector<2x8x64xf32> to vector<2x8x64xbf16>
    %cst_22 = arith.constant dense<0.000000e+00> : vector<2x8x8xf32>
    %43 = tpu.matmul %41, %42, %cst_22 {dimension_numbers = #tpu.dot_dimension_numbers<[2], [2], [1], [1], [0, 0, 0, 1, 1, 1], [0], [0]>} : vector<2x8x64xbf16>, vector<2x8x64xbf16>, vector<2x8x8xf32> -> vector<2x8x8xf32>
    %cst_23 = arith.constant 1.250000e-01 : f32
    %44 = vector.broadcast %cst_23 : f32 to vector<2x8x8xf32>
    %45 = arith.mulf %43, %44 : vector<2x8x8xf32>
    %46 = vector.shape_cast %1 : vector<1x8xf32> to vector<1x1x8xf32>
    %47 = vector.broadcast %46 : vector<1x1x8xf32> to vector<2x8x8xf32>
    %48 = arith.addf %45, %47 : vector<2x8x8xf32>
    %cst_24 = arith.constant dense<0xFF800000> : vector<2x8xf32>
    %49 = vector.multi_reduction <maximumf>, %48, %cst_24 [2] : vector<2x8x8xf32> to vector<2x8xf32>
    %50 = vector.shape_cast %49 : vector<2x8xf32> to vector<2x8x1xf32>
    %51 = vector.broadcast %50 : vector<2x8x1xf32> to vector<2x8x8xf32>
    %52 = arith.subf %48, %51 : vector<2x8x8xf32>
    %53 = math.exp %52 : vector<2x8x8xf32>
    %cst_25 = arith.constant dense<0.000000e+00> : vector<2x8xf32>
    %54 = vector.multi_reduction <add>, %53, %cst_25 [2] : vector<2x8x8xf32> to vector<2x8xf32>
    %55 = vector.shape_cast %54 : vector<2x8xf32> to vector<2x8x1xf32>
    %56 = tpu.reciprocal %55 {approx = true} : vector<2x8x1xf32> -> vector<2x8x1xf32>
    %57 = vector.broadcast %56 : vector<2x8x1xf32> to vector<2x8x8xf32>
    %58 = arith.mulf %53, %57 : vector<2x8x8xf32>
    %59 = arith.truncf %58 : vector<2x8x8xf32> to vector<2x8x8xbf16>
    %60 = arith.truncf %40 : vector<2x8x64xf32> to vector<2x8x64xbf16>
    %cst_26 = arith.constant dense<0.000000e+00> : vector<2x8x64xf32>
    %61 = tpu.matmul %59, %60, %cst_26 {dimension_numbers = #tpu.dot_dimension_numbers<[2], [1], [1], [2], [0, 0, 0, 1, 1, 2], [0], [0]>} : vector<2x8x8xbf16>, vector<2x8x64xbf16>, vector<2x8x64xf32> -> vector<2x8x64xf32>
    %62 = arith.truncf %61 : vector<2x8x64xf32> to vector<2x8x64xbf16>
    %c0_27 = arith.constant 0 : index
    %c0_28 = arith.constant 0 : index
    %c0_29 = arith.constant 0 : index
    %c0_30 = arith.constant 0 : index
    %63 = vector.load %arg7[%c0_27, %c0_28, %c0_29, %c0_30] : memref<2x2x64x128xbf16, #tpu.memory_space<vmem>>, vector<1x2x64x128xbf16>
    %64 = vector.shape_cast %63 : vector<1x2x64x128xbf16> to vector<2x64x128xbf16>
    %cst_31 = arith.constant dense<0.000000e+00> : vector<2x8x128xf32>
    %65 = tpu.matmul %62, %64, %cst_31 {dimension_numbers = #tpu.dot_dimension_numbers<[2], [1], [1], [2], [0, 0, 0, 1, 1, 2], [0], [0]>} : vector<2x8x64xbf16>, vector<2x64x128xbf16>, vector<2x8x128xf32> -> vector<2x8x128xf32>
    %cst_32 = arith.constant dense<0.000000e+00> : vector<8x128xf32>
    %66 = vector.multi_reduction <add>, %65, %cst_32 [0] : vector<2x8x128xf32> to vector<8x128xf32>
    %c0_33 = arith.constant 0 : index
    %c0_34 = arith.constant 0 : index
    %c0_35 = arith.constant 0 : index
    %67 = vector.load %arg8[%c0_33, %c0_34, %c0_35] : memref<2x1x128xf32, #tpu.memory_space<vmem>>, vector<1x1x128xf32>
    %68 = vector.shape_cast %67 : vector<1x1x128xf32> to vector<1x128xf32>
    %69 = vector.broadcast %68 : vector<1x128xf32> to vector<8x128xf32>
    %70 = arith.addf %66, %69 : vector<8x128xf32>
    %71 = arith.addf %27, %70 : vector<8x128xf32>
    %c0_36 = arith.constant 0 : index
    %c0_37 = arith.constant 0 : index
    %c0_38 = arith.constant 0 : index
    %72 = vector.load %arg9[%c0_36, %c0_37, %c0_38] : memref<2x1x128xf32, #tpu.memory_space<vmem>>, vector<1x1x128xf32>
    %73 = vector.shape_cast %72 : vector<1x1x128xf32> to vector<1x128xf32>
    %c0_39 = arith.constant 0 : index
    %c0_40 = arith.constant 0 : index
    %c0_41 = arith.constant 0 : index
    %74 = vector.load %arg10[%c0_39, %c0_40, %c0_41] : memref<2x1x128xf32, #tpu.memory_space<vmem>>, vector<1x1x128xf32>
    %75 = vector.shape_cast %74 : vector<1x1x128xf32> to vector<1x128xf32>
    %cst_42 = arith.constant dense<0.000000e+00> : vector<8xf32>
    %76 = vector.multi_reduction <add>, %71, %cst_42 [1] : vector<8x128xf32> to vector<8xf32>
    %77 = vector.shape_cast %76 : vector<8xf32> to vector<8x1xf32>
    %cst_43 = arith.constant 1.280000e+02 : f32
    %78 = vector.broadcast %cst_43 : f32 to vector<8x1xf32>
    %79 = arith.divf %77, %78 : vector<8x1xf32>
    %80 = vector.broadcast %79 : vector<8x1xf32> to vector<8x128xf32>
    %81 = arith.subf %71, %80 : vector<8x128xf32>
    %82 = arith.mulf %81, %81 : vector<8x128xf32>
    %cst_44 = arith.constant dense<0.000000e+00> : vector<8xf32>
    %83 = vector.multi_reduction <add>, %82, %cst_44 [1] : vector<8x128xf32> to vector<8xf32>
    %84 = vector.shape_cast %83 : vector<8xf32> to vector<8x1xf32>
    %cst_45 = arith.constant 1.280000e+02 : f32
    %85 = vector.broadcast %cst_45 : f32 to vector<8x1xf32>
    %86 = arith.divf %84, %85 : vector<8x1xf32>
    %cst_46 = arith.constant 9.99999996E-13 : f32
    %87 = vector.broadcast %cst_46 : f32 to vector<8x1xf32>
    %88 = arith.addf %86, %87 : vector<8x1xf32>
    %89 = math.rsqrt %88 : vector<8x1xf32>
    %90 = vector.broadcast %79 : vector<8x1xf32> to vector<8x128xf32>
    %91 = arith.subf %71, %90 : vector<8x128xf32>
    %92 = vector.broadcast %89 : vector<8x1xf32> to vector<8x128xf32>
    %93 = arith.mulf %91, %92 : vector<8x128xf32>
    %94 = vector.broadcast %73 : vector<1x128xf32> to vector<8x128xf32>
    %95 = arith.mulf %93, %94 : vector<8x128xf32>
    %96 = vector.broadcast %75 : vector<1x128xf32> to vector<8x128xf32>
    %97 = arith.addf %95, %96 : vector<8x128xf32>
    %c0_47 = arith.constant 0 : index
    %c0_48 = arith.constant 0 : index
    %c0_49 = arith.constant 0 : index
    %98 = vector.load %arg11[%c0_47, %c0_48, %c0_49] : memref<2x128x256xbf16, #tpu.memory_space<vmem>>, vector<1x128x256xbf16>
    %99 = vector.shape_cast %98 : vector<1x128x256xbf16> to vector<128x256xbf16>
    %c0_50 = arith.constant 0 : index
    %c0_51 = arith.constant 0 : index
    %c0_52 = arith.constant 0 : index
    %100 = vector.load %arg12[%c0_50, %c0_51, %c0_52] : memref<2x1x256xf32, #tpu.memory_space<vmem>>, vector<1x1x256xf32>
    %101 = vector.shape_cast %100 : vector<1x1x256xf32> to vector<1x256xf32>
    %102 = arith.truncf %97 : vector<8x128xf32> to vector<8x128xbf16>
    %cst_53 = arith.constant dense<0.000000e+00> : vector<8x256xf32>
    %103 = tpu.matmul %102, %99, %cst_53 {dimension_numbers = #tpu.dot_dimension_numbers<[1], [0], [0], [1], [0, 0, 1, 1], [], []>} : vector<8x128xbf16>, vector<128x256xbf16>, vector<8x256xf32> -> vector<8x256xf32>
    %104 = vector.broadcast %101 : vector<1x256xf32> to vector<8x256xf32>
    %105 = arith.addf %103, %104 : vector<8x256xf32>
    %106 = arith.mulf %105, %105 : vector<8x256xf32>
    %107 = arith.mulf %105, %106 : vector<8x256xf32>
    %cst_54 = arith.constant 4.471500e-02 : f32
    %108 = vector.broadcast %cst_54 : f32 to vector<8x256xf32>
    %109 = arith.mulf %108, %107 : vector<8x256xf32>
    %110 = arith.addf %105, %109 : vector<8x256xf32>
    %cst_55 = arith.constant 0.797884583 : f32
    %111 = vector.broadcast %cst_55 : f32 to vector<8x256xf32>
    %112 = arith.mulf %111, %110 : vector<8x256xf32>
    %113 = math.tanh %112 : vector<8x256xf32>
    %cst_56 = arith.constant 1.000000e+00 : f32
    %114 = vector.broadcast %cst_56 : f32 to vector<8x256xf32>
    %115 = arith.addf %114, %113 : vector<8x256xf32>
    %cst_57 = arith.constant 5.000000e-01 : f32
    %116 = vector.broadcast %cst_57 : f32 to vector<8x256xf32>
    %117 = arith.mulf %116, %115 : vector<8x256xf32>
    %118 = arith.mulf %105, %117 : vector<8x256xf32>
    %c0_58 = arith.constant 0 : index
    %c0_59 = arith.constant 0 : index
    %c0_60 = arith.constant 0 : index
    %119 = vector.load %arg13[%c0_58, %c0_59, %c0_60] : memref<2x256x128xbf16, #tpu.memory_space<vmem>>, vector<1x256x128xbf16>
    %120 = vector.shape_cast %119 : vector<1x256x128xbf16> to vector<256x128xbf16>
    %c0_61 = arith.constant 0 : index
    %c0_62 = arith.constant 0 : index
    %c0_63 = arith.constant 0 : index
    %121 = vector.load %arg14[%c0_61, %c0_62, %c0_63] : memref<2x1x128xf32, #tpu.memory_space<vmem>>, vector<1x1x128xf32>
    %122 = vector.shape_cast %121 : vector<1x1x128xf32> to vector<1x128xf32>
    %123 = arith.truncf %118 : vector<8x256xf32> to vector<8x256xbf16>
    %cst_64 = arith.constant dense<0.000000e+00> : vector<8x128xf32>
    %124 = tpu.matmul %123, %120, %cst_64 {dimension_numbers = #tpu.dot_dimension_numbers<[1], [0], [0], [1], [0, 0, 1, 1], [], []>} : vector<8x256xbf16>, vector<256x128xbf16>, vector<8x128xf32> -> vector<8x128xf32>
    %125 = vector.broadcast %122 : vector<1x128xf32> to vector<8x128xf32>
    %126 = arith.addf %124, %125 : vector<8x128xf32>
    %127 = arith.addf %97, %126 : vector<8x128xf32>
    %c0_65 = arith.constant 0 : index
    %c0_66 = arith.constant 0 : index
    %c0_67 = arith.constant 0 : index
    %128 = vector.load %arg15[%c0_65, %c0_66, %c0_67] : memref<2x1x128xf32, #tpu.memory_space<vmem>>, vector<1x1x128xf32>
    %129 = vector.shape_cast %128 : vector<1x1x128xf32> to vector<1x128xf32>
    %c0_68 = arith.constant 0 : index
    %c0_69 = arith.constant 0 : index
    %c0_70 = arith.constant 0 : index
    %130 = vector.load %arg16[%c0_68, %c0_69, %c0_70] : memref<2x1x128xf32, #tpu.memory_space<vmem>>, vector<1x1x128xf32>
    %131 = vector.shape_cast %130 : vector<1x1x128xf32> to vector<1x128xf32>
    %cst_71 = arith.constant dense<0.000000e+00> : vector<8xf32>
    %132 = vector.multi_reduction <add>, %127, %cst_71 [1] : vector<8x128xf32> to vector<8xf32>
    %133 = vector.shape_cast %132 : vector<8xf32> to vector<8x1xf32>
    %cst_72 = arith.constant 1.280000e+02 : f32
    %134 = vector.broadcast %cst_72 : f32 to vector<8x1xf32>
    %135 = arith.divf %133, %134 : vector<8x1xf32>
    %136 = vector.broadcast %135 : vector<8x1xf32> to vector<8x128xf32>
    %137 = arith.subf %127, %136 : vector<8x128xf32>
    %138 = arith.mulf %137, %137 : vector<8x128xf32>
    %cst_73 = arith.constant dense<0.000000e+00> : vector<8xf32>
    %139 = vector.multi_reduction <add>, %138, %cst_73 [1] : vector<8x128xf32> to vector<8xf32>
    %140 = vector.shape_cast %139 : vector<8xf32> to vector<8x1xf32>
    %cst_74 = arith.constant 1.280000e+02 : f32
    %141 = vector.broadcast %cst_74 : f32 to vector<8x1xf32>
    %142 = arith.divf %140, %141 : vector<8x1xf32>
    %cst_75 = arith.constant 9.99999996E-13 : f32
    %143 = vector.broadcast %cst_75 : f32 to vector<8x1xf32>
    %144 = arith.addf %142, %143 : vector<8x1xf32>
    %145 = math.rsqrt %144 : vector<8x1xf32>
    %146 = vector.broadcast %135 : vector<8x1xf32> to vector<8x128xf32>
    %147 = arith.subf %127, %146 : vector<8x128xf32>
    %148 = vector.broadcast %145 : vector<8x1xf32> to vector<8x128xf32>
    %149 = arith.mulf %147, %148 : vector<8x128xf32>
    %150 = vector.broadcast %129 : vector<1x128xf32> to vector<8x128xf32>
    %151 = arith.mulf %149, %150 : vector<8x128xf32>
    %152 = vector.broadcast %131 : vector<1x128xf32> to vector<8x128xf32>
    %153 = arith.addf %151, %152 : vector<8x128xf32>
    %154 = arith.truncf %153 : vector<8x128xf32> to vector<8x128xbf16>
    %155 = vector.shape_cast %154 : vector<8x128xbf16> to vector<1x8x128xbf16>
    %156 = vector.broadcast %155 : vector<1x8x128xbf16> to vector<6x8x128xbf16>
    %c1 = arith.constant 1 : index
    %c0_76 = arith.constant 0 : index
    %c0_77 = arith.constant 0 : index
    %c0_78 = arith.constant 0 : index
    %157 = vector.load %arg5[%c1, %c0_76, %c0_77, %c0_78] : memref<2x6x128x64xbf16, #tpu.memory_space<vmem>>, vector<1x6x128x64xbf16>
    %158 = vector.shape_cast %157 : vector<1x6x128x64xbf16> to vector<6x128x64xbf16>
    %cst_79 = arith.constant dense<0.000000e+00> : vector<6x8x64xf32>
    %159 = tpu.matmul %156, %158, %cst_79 {dimension_numbers = #tpu.dot_dimension_numbers<[2], [1], [1], [2], [0, 0, 0, 1, 1, 2], [0], [0]>} : vector<6x8x128xbf16>, vector<6x128x64xbf16>, vector<6x8x64xf32> -> vector<6x8x64xf32>
    %c1_80 = arith.constant 1 : index
    %c0_81 = arith.constant 0 : index
    %c0_82 = arith.constant 0 : index
    %c0_83 = arith.constant 0 : index
    %160 = vector.load %arg6[%c1_80, %c0_81, %c0_82, %c0_83] : memref<2x6x1x64xf32, #tpu.memory_space<vmem>>, vector<1x6x1x64xf32>
    %161 = vector.shape_cast %160 : vector<1x6x1x64xf32> to vector<6x1x64xf32>
    %162 = vector.broadcast %161 : vector<6x1x64xf32> to vector<6x8x64xf32>
    %163 = arith.addf %159, %162 : vector<6x8x64xf32>
    %164 = vector.extract_strided_slice %163 {offsets = [0, 0, 0], sizes = [2, 8, 64], strides = [1, 1, 1]} : vector<6x8x64xf32> to vector<2x8x64xf32>
    %165 = vector.extract_strided_slice %163 {offsets = [2, 0, 0], sizes = [2, 8, 64], strides = [1, 1, 1]} : vector<6x8x64xf32> to vector<2x8x64xf32>
    %166 = vector.extract_strided_slice %163 {offsets = [4, 0, 0], sizes = [2, 8, 64], strides = [1, 1, 1]} : vector<6x8x64xf32> to vector<2x8x64xf32>
    %167 = arith.truncf %164 : vector<2x8x64xf32> to vector<2x8x64xbf16>
    %168 = arith.truncf %165 : vector<2x8x64xf32> to vector<2x8x64xbf16>
    %cst_84 = arith.constant dense<0.000000e+00> : vector<2x8x8xf32>
    %169 = tpu.matmul %167, %168, %cst_84 {dimension_numbers = #tpu.dot_dimension_numbers<[2], [2], [1], [1], [0, 0, 0, 1, 1, 1], [0], [0]>} : vector<2x8x64xbf16>, vector<2x8x64xbf16>, vector<2x8x8xf32> -> vector<2x8x8xf32>
    %cst_85 = arith.constant 1.250000e-01 : f32
    %170 = vector.broadcast %cst_85 : f32 to vector<2x8x8xf32>
    %171 = arith.mulf %169, %170 : vector<2x8x8xf32>
    %172 = vector.shape_cast %1 : vector<1x8xf32> to vector<1x1x8xf32>
    %173 = vector.broadcast %172 : vector<1x1x8xf32> to vector<2x8x8xf32>
    %174 = arith.addf %171, %173 : vector<2x8x8xf32>
    %cst_86 = arith.constant dense<0xFF800000> : vector<2x8xf32>
    %175 = vector.multi_reduction <maximumf>, %174, %cst_86 [2] : vector<2x8x8xf32> to vector<2x8xf32>
    %176 = vector.shape_cast %175 : vector<2x8xf32> to vector<2x8x1xf32>
    %177 = vector.broadcast %176 : vector<2x8x1xf32> to vector<2x8x8xf32>
    %178 = arith.subf %174, %177 : vector<2x8x8xf32>
    %179 = math.exp %178 : vector<2x8x8xf32>
    %cst_87 = arith.constant dense<0.000000e+00> : vector<2x8xf32>
    %180 = vector.multi_reduction <add>, %179, %cst_87 [2] : vector<2x8x8xf32> to vector<2x8xf32>
    %181 = vector.shape_cast %180 : vector<2x8xf32> to vector<2x8x1xf32>
    %182 = tpu.reciprocal %181 {approx = true} : vector<2x8x1xf32> -> vector<2x8x1xf32>
    %183 = vector.broadcast %182 : vector<2x8x1xf32> to vector<2x8x8xf32>
    %184 = arith.mulf %179, %183 : vector<2x8x8xf32>
    %185 = arith.truncf %184 : vector<2x8x8xf32> to vector<2x8x8xbf16>
    %186 = arith.truncf %166 : vector<2x8x64xf32> to vector<2x8x64xbf16>
    %cst_88 = arith.constant dense<0.000000e+00> : vector<2x8x64xf32>
    %187 = tpu.matmul %185, %186, %cst_88 {dimension_numbers = #tpu.dot_dimension_numbers<[2], [1], [1], [2], [0, 0, 0, 1, 1, 2], [0], [0]>} : vector<2x8x8xbf16>, vector<2x8x64xbf16>, vector<2x8x64xf32> -> vector<2x8x64xf32>
    %188 = arith.truncf %187 : vector<2x8x64xf32> to vector<2x8x64xbf16>
    %c1_89 = arith.constant 1 : index
    %c0_90 = arith.constant 0 : index
    %c0_91 = arith.constant 0 : index
    %c0_92 = arith.constant 0 : index
    %189 = vector.load %arg7[%c1_89, %c0_90, %c0_91, %c0_92] : memref<2x2x64x128xbf16, #tpu.memory_space<vmem>>, vector<1x2x64x128xbf16>
    %190 = vector.shape_cast %189 : vector<1x2x64x128xbf16> to vector<2x64x128xbf16>
    %cst_93 = arith.constant dense<0.000000e+00> : vector<2x8x128xf32>
    %191 = tpu.matmul %188, %190, %cst_93 {dimension_numbers = #tpu.dot_dimension_numbers<[2], [1], [1], [2], [0, 0, 0, 1, 1, 2], [0], [0]>} : vector<2x8x64xbf16>, vector<2x64x128xbf16>, vector<2x8x128xf32> -> vector<2x8x128xf32>
    %cst_94 = arith.constant dense<0.000000e+00> : vector<8x128xf32>
    %192 = vector.multi_reduction <add>, %191, %cst_94 [0] : vector<2x8x128xf32> to vector<8x128xf32>
    %c1_95 = arith.constant 1 : index
    %c0_96 = arith.constant 0 : index
    %c0_97 = arith.constant 0 : index
    %193 = vector.load %arg8[%c1_95, %c0_96, %c0_97] : memref<2x1x128xf32, #tpu.memory_space<vmem>>, vector<1x1x128xf32>
    %194 = vector.shape_cast %193 : vector<1x1x128xf32> to vector<1x128xf32>
    %195 = vector.broadcast %194 : vector<1x128xf32> to vector<8x128xf32>
    %196 = arith.addf %192, %195 : vector<8x128xf32>
    %197 = arith.addf %153, %196 : vector<8x128xf32>
    %c1_98 = arith.constant 1 : index
    %c0_99 = arith.constant 0 : index
    %c0_100 = arith.constant 0 : index
    %198 = vector.load %arg9[%c1_98, %c0_99, %c0_100] : memref<2x1x128xf32, #tpu.memory_space<vmem>>, vector<1x1x128xf32>
    %199 = vector.shape_cast %198 : vector<1x1x128xf32> to vector<1x128xf32>
    %c1_101 = arith.constant 1 : index
    %c0_102 = arith.constant 0 : index
    %c0_103 = arith.constant 0 : index
    %200 = vector.load %arg10[%c1_101, %c0_102, %c0_103] : memref<2x1x128xf32, #tpu.memory_space<vmem>>, vector<1x1x128xf32>
    %201 = vector.shape_cast %200 : vector<1x1x128xf32> to vector<1x128xf32>
    %cst_104 = arith.constant dense<0.000000e+00> : vector<8xf32>
    %202 = vector.multi_reduction <add>, %197, %cst_104 [1] : vector<8x128xf32> to vector<8xf32>
    %203 = vector.shape_cast %202 : vector<8xf32> to vector<8x1xf32>
    %cst_105 = arith.constant 1.280000e+02 : f32
    %204 = vector.broadcast %cst_105 : f32 to vector<8x1xf32>
    %205 = arith.divf %203, %204 : vector<8x1xf32>
    %206 = vector.broadcast %205 : vector<8x1xf32> to vector<8x128xf32>
    %207 = arith.subf %197, %206 : vector<8x128xf32>
    %208 = arith.mulf %207, %207 : vector<8x128xf32>
    %cst_106 = arith.constant dense<0.000000e+00> : vector<8xf32>
    %209 = vector.multi_reduction <add>, %208, %cst_106 [1] : vector<8x128xf32> to vector<8xf32>
    %210 = vector.shape_cast %209 : vector<8xf32> to vector<8x1xf32>
    %cst_107 = arith.constant 1.280000e+02 : f32
    %211 = vector.broadcast %cst_107 : f32 to vector<8x1xf32>
    %212 = arith.divf %210, %211 : vector<8x1xf32>
    %cst_108 = arith.constant 9.99999996E-13 : f32
    %213 = vector.broadcast %cst_108 : f32 to vector<8x1xf32>
    %214 = arith.addf %212, %213 : vector<8x1xf32>
    %215 = math.rsqrt %214 : vector<8x1xf32>
    %216 = vector.broadcast %205 : vector<8x1xf32> to vector<8x128xf32>
    %217 = arith.subf %197, %216 : vector<8x128xf32>
    %218 = vector.broadcast %215 : vector<8x1xf32> to vector<8x128xf32>
    %219 = arith.mulf %217, %218 : vector<8x128xf32>
    %220 = vector.broadcast %199 : vector<1x128xf32> to vector<8x128xf32>
    %221 = arith.mulf %219, %220 : vector<8x128xf32>
    %222 = vector.broadcast %201 : vector<1x128xf32> to vector<8x128xf32>
    %223 = arith.addf %221, %222 : vector<8x128xf32>
    %c1_109 = arith.constant 1 : index
    %c0_110 = arith.constant 0 : index
    %c0_111 = arith.constant 0 : index
    %224 = vector.load %arg11[%c1_109, %c0_110, %c0_111] : memref<2x128x256xbf16, #tpu.memory_space<vmem>>, vector<1x128x256xbf16>
    %225 = vector.shape_cast %224 : vector<1x128x256xbf16> to vector<128x256xbf16>
    %c1_112 = arith.constant 1 : index
    %c0_113 = arith.constant 0 : index
    %c0_114 = arith.constant 0 : index
    %226 = vector.load %arg12[%c1_112, %c0_113, %c0_114] : memref<2x1x256xf32, #tpu.memory_space<vmem>>, vector<1x1x256xf32>
    %227 = vector.shape_cast %226 : vector<1x1x256xf32> to vector<1x256xf32>
    %228 = arith.truncf %223 : vector<8x128xf32> to vector<8x128xbf16>
    %cst_115 = arith.constant dense<0.000000e+00> : vector<8x256xf32>
    %229 = tpu.matmul %228, %225, %cst_115 {dimension_numbers = #tpu.dot_dimension_numbers<[1], [0], [0], [1], [0, 0, 1, 1], [], []>} : vector<8x128xbf16>, vector<128x256xbf16>, vector<8x256xf32> -> vector<8x256xf32>
    %230 = vector.broadcast %227 : vector<1x256xf32> to vector<8x256xf32>
    %231 = arith.addf %229, %230 : vector<8x256xf32>
    %232 = arith.mulf %231, %231 : vector<8x256xf32>
    %233 = arith.mulf %231, %232 : vector<8x256xf32>
    %cst_116 = arith.constant 4.471500e-02 : f32
    %234 = vector.broadcast %cst_116 : f32 to vector<8x256xf32>
    %235 = arith.mulf %234, %233 : vector<8x256xf32>
    %236 = arith.addf %231, %235 : vector<8x256xf32>
    %cst_117 = arith.constant 0.797884583 : f32
    %237 = vector.broadcast %cst_117 : f32 to vector<8x256xf32>
    %238 = arith.mulf %237, %236 : vector<8x256xf32>
    %239 = math.tanh %238 : vector<8x256xf32>
    %cst_118 = arith.constant 1.000000e+00 : f32
    %240 = vector.broadcast %cst_118 : f32 to vector<8x256xf32>
    %241 = arith.addf %240, %239 : vector<8x256xf32>
    %cst_119 = arith.constant 5.000000e-01 : f32
    %242 = vector.broadcast %cst_119 : f32 to vector<8x256xf32>
    %243 = arith.mulf %242, %241 : vector<8x256xf32>
    %244 = arith.mulf %231, %243 : vector<8x256xf32>
    %c1_120 = arith.constant 1 : index
    %c0_121 = arith.constant 0 : index
    %c0_122 = arith.constant 0 : index
    %245 = vector.load %arg13[%c1_120, %c0_121, %c0_122] : memref<2x256x128xbf16, #tpu.memory_space<vmem>>, vector<1x256x128xbf16>
    %246 = vector.shape_cast %245 : vector<1x256x128xbf16> to vector<256x128xbf16>
    %c1_123 = arith.constant 1 : index
    %c0_124 = arith.constant 0 : index
    %c0_125 = arith.constant 0 : index
    %247 = vector.load %arg14[%c1_123, %c0_124, %c0_125] : memref<2x1x128xf32, #tpu.memory_space<vmem>>, vector<1x1x128xf32>
    %248 = vector.shape_cast %247 : vector<1x1x128xf32> to vector<1x128xf32>
    %249 = arith.truncf %244 : vector<8x256xf32> to vector<8x256xbf16>
    %cst_126 = arith.constant dense<0.000000e+00> : vector<8x128xf32>
    %250 = tpu.matmul %249, %246, %cst_126 {dimension_numbers = #tpu.dot_dimension_numbers<[1], [0], [0], [1], [0, 0, 1, 1], [], []>} : vector<8x256xbf16>, vector<256x128xbf16>, vector<8x128xf32> -> vector<8x128xf32>
    %251 = vector.broadcast %248 : vector<1x128xf32> to vector<8x128xf32>
    %252 = arith.addf %250, %251 : vector<8x128xf32>
    %253 = arith.addf %223, %252 : vector<8x128xf32>
    %c1_127 = arith.constant 1 : index
    %c0_128 = arith.constant 0 : index
    %c0_129 = arith.constant 0 : index
    %254 = vector.load %arg15[%c1_127, %c0_128, %c0_129] : memref<2x1x128xf32, #tpu.memory_space<vmem>>, vector<1x1x128xf32>
    %255 = vector.shape_cast %254 : vector<1x1x128xf32> to vector<1x128xf32>
    %c1_130 = arith.constant 1 : index
    %c0_131 = arith.constant 0 : index
    %c0_132 = arith.constant 0 : index
    %256 = vector.load %arg16[%c1_130, %c0_131, %c0_132] : memref<2x1x128xf32, #tpu.memory_space<vmem>>, vector<1x1x128xf32>
    %257 = vector.shape_cast %256 : vector<1x1x128xf32> to vector<1x128xf32>
    %cst_133 = arith.constant dense<0.000000e+00> : vector<8xf32>
    %258 = vector.multi_reduction <add>, %253, %cst_133 [1] : vector<8x128xf32> to vector<8xf32>
    %259 = vector.shape_cast %258 : vector<8xf32> to vector<8x1xf32>
    %cst_134 = arith.constant 1.280000e+02 : f32
    %260 = vector.broadcast %cst_134 : f32 to vector<8x1xf32>
    %261 = arith.divf %259, %260 : vector<8x1xf32>
    %262 = vector.broadcast %261 : vector<8x1xf32> to vector<8x128xf32>
    %263 = arith.subf %253, %262 : vector<8x128xf32>
    %264 = arith.mulf %263, %263 : vector<8x128xf32>
    %cst_135 = arith.constant dense<0.000000e+00> : vector<8xf32>
    %265 = vector.multi_reduction <add>, %264, %cst_135 [1] : vector<8x128xf32> to vector<8xf32>
    %266 = vector.shape_cast %265 : vector<8xf32> to vector<8x1xf32>
    %cst_136 = arith.constant 1.280000e+02 : f32
    %267 = vector.broadcast %cst_136 : f32 to vector<8x1xf32>
    %268 = arith.divf %266, %267 : vector<8x1xf32>
    %cst_137 = arith.constant 9.99999996E-13 : f32
    %269 = vector.broadcast %cst_137 : f32 to vector<8x1xf32>
    %270 = arith.addf %268, %269 : vector<8x1xf32>
    %271 = math.rsqrt %270 : vector<8x1xf32>
    %272 = vector.broadcast %261 : vector<8x1xf32> to vector<8x128xf32>
    %273 = arith.subf %253, %272 : vector<8x128xf32>
    %274 = vector.broadcast %271 : vector<8x1xf32> to vector<8x128xf32>
    %275 = arith.mulf %273, %274 : vector<8x128xf32>
    %276 = vector.broadcast %255 : vector<1x128xf32> to vector<8x128xf32>
    %277 = arith.mulf %275, %276 : vector<8x128xf32>
    %278 = vector.broadcast %257 : vector<1x128xf32> to vector<8x128xf32>
    %279 = arith.addf %277, %278 : vector<8x128xf32>
    %280 = vector.extract_strided_slice %279 {offsets = [0, 0], sizes = [1, 128], strides = [1, 1]} : vector<8x128xf32> to vector<1x128xf32>
    %c0_138 = arith.constant 0 : index
    %c0_139 = arith.constant 0 : index
    %281 = vector.load %arg17[%c0_138, %c0_139] : memref<128x128xbf16, #tpu.memory_space<vmem>>, vector<128x128xbf16>
    %c0_140 = arith.constant 0 : index
    %c0_141 = arith.constant 0 : index
    %282 = vector.load %arg18[%c0_140, %c0_141] : memref<1x128xf32, #tpu.memory_space<vmem>>, vector<1x128xf32>
    %283 = arith.truncf %280 : vector<1x128xf32> to vector<1x128xbf16>
    %cst_142 = arith.constant dense<0.000000e+00> : vector<1x128xf32>
    %284 = tpu.matmul %283, %281, %cst_142 {dimension_numbers = #tpu.dot_dimension_numbers<[1], [0], [0], [1], [0, 0, 1, 1], [], []>} : vector<1x128xbf16>, vector<128x128xbf16>, vector<1x128xf32> -> vector<1x128xf32>
    %285 = arith.addf %284, %282 : vector<1x128xf32>
    %286 = math.tanh %285 : vector<1x128xf32>
    %c0_143 = arith.constant 0 : index
    %c0_144 = arith.constant 0 : index
    %287 = vector.load %arg19[%c0_143, %c0_144] : memref<128x128xbf16, #tpu.memory_space<vmem>>, vector<128x128xbf16>
    %c0_145 = arith.constant 0 : index
    %c0_146 = arith.constant 0 : index
    %288 = vector.load %arg20[%c0_145, %c0_146] : memref<1x128xf32, #tpu.memory_space<vmem>>, vector<1x128xf32>
    %289 = arith.truncf %286 : vector<1x128xf32> to vector<1x128xbf16>
    %cst_147 = arith.constant dense<0.000000e+00> : vector<1x128xf32>
    %290 = tpu.matmul %289, %287, %cst_147 {dimension_numbers = #tpu.dot_dimension_numbers<[1], [0], [0], [1], [0, 0, 1, 1], [], []>} : vector<1x128xbf16>, vector<128x128xbf16>, vector<1x128xf32> -> vector<1x128xf32>
    %291 = arith.addf %290, %288 : vector<1x128xf32>
    %c0_148 = arith.constant 0 : index
    %c0_149 = arith.constant 0 : index
    %c0_150 = arith.constant 0 : index
    %292 = vector.load %arg21[%c0_148, %c0_149, %c0_150] : memref<1x1x128xf32, #tpu.memory_space<vmem>>, vector<1x1x128xf32>
    %293 = vector.shape_cast %292 : vector<1x1x128xf32> to vector<1x128xf32>
    %294 = vector.shape_cast %291 : vector<1x128xf32> to vector<1x1x128xf32>
    tpu.vector_store %arg21[%c0_148, %c0_149, %c0_150], %294 {strides = array<i32>} : memref<1x1x128xf32, #tpu.memory_space<vmem>>, vector<1x1x128xf32>,
    return
  }
  func.func @transform_0(%arg0: i32) -> (i32, i32, i32) {
    %c0_i32 = arith.constant 0 : i32
    %c0_i32_0 = arith.constant 0 : i32
    %c0_i32_1 = arith.constant 0 : i32
    return %arg0, %c0_i32, %c0_i32_0 : i32, i32, i32
  }
  func.func @transform_1(%arg0: i32) -> (i32, i32, i32) {
    %c0_i32 = arith.constant 0 : i32
    %c0_i32_0 = arith.constant 0 : i32
    %c0_i32_1 = arith.constant 0 : i32
    return %arg0, %c0_i32, %c0_i32_0 : i32, i32, i32
  }
  func.func @transform_2(%arg0: i32) -> (i32, i32) {
    %c0_i32 = arith.constant 0 : i32
    %c0_i32_0 = arith.constant 0 : i32
    %c0_i32_1 = arith.constant 0 : i32
    return %c0_i32, %c0_i32_0 : i32, i32
  }
  func.func @transform_3(%arg0: i32) -> (i32, i32) {
    %c0_i32 = arith.constant 0 : i32
    %c0_i32_0 = arith.constant 0 : i32
    %c0_i32_1 = arith.constant 0 : i32
    return %c0_i32, %c0_i32_0 : i32, i32
  }
  func.func @transform_4(%arg0: i32) -> (i32, i32, i32, i32) {
    %c0_i32 = arith.constant 0 : i32
    %c0_i32_0 = arith.constant 0 : i32
    %c0_i32_1 = arith.constant 0 : i32
    %c0_i32_2 = arith.constant 0 : i32
    %c0_i32_3 = arith.constant 0 : i32
    return %c0_i32, %c0_i32_0, %c0_i32_1, %c0_i32_2 : i32, i32, i32, i32
  }
  func.func @transform_5(%arg0: i32) -> (i32, i32, i32, i32) {
    %c0_i32 = arith.constant 0 : i32
    %c0_i32_0 = arith.constant 0 : i32
    %c0_i32_1 = arith.constant 0 : i32
    %c0_i32_2 = arith.constant 0 : i32
    %c0_i32_3 = arith.constant 0 : i32
    return %c0_i32, %c0_i32_0, %c0_i32_1, %c0_i32_2 : i32, i32, i32, i32
  }
  func.func @transform_6(%arg0: i32) -> (i32, i32, i32, i32) {
    %c0_i32 = arith.constant 0 : i32
    %c0_i32_0 = arith.constant 0 : i32
    %c0_i32_1 = arith.constant 0 : i32
    %c0_i32_2 = arith.constant 0 : i32
    %c0_i32_3 = arith.constant 0 : i32
    return %c0_i32, %c0_i32_0, %c0_i32_1, %c0_i32_2 : i32, i32, i32, i32
  }
  func.func @transform_7(%arg0: i32) -> (i32, i32, i32) {
    %c0_i32 = arith.constant 0 : i32
    %c0_i32_0 = arith.constant 0 : i32
    %c0_i32_1 = arith.constant 0 : i32
    %c0_i32_2 = arith.constant 0 : i32
    return %c0_i32, %c0_i32_0, %c0_i32_1 : i32, i32, i32
  }
  func.func @transform_8(%arg0: i32) -> (i32, i32, i32) {
    %c0_i32 = arith.constant 0 : i32
    %c0_i32_0 = arith.constant 0 : i32
    %c0_i32_1 = arith.constant 0 : i32
    %c0_i32_2 = arith.constant 0 : i32
    return %c0_i32, %c0_i32_0, %c0_i32_1 : i32, i32, i32
  }
  func.func @transform_9(%arg0: i32) -> (i32, i32, i32) {
    %c0_i32 = arith.constant 0 : i32
    %c0_i32_0 = arith.constant 0 : i32
    %c0_i32_1 = arith.constant 0 : i32
    %c0_i32_2 = arith.constant 0 : i32
    return %c0_i32, %c0_i32_0, %c0_i32_1 : i32, i32, i32
  }
  func.func @transform_10(%arg0: i32) -> (i32, i32, i32) {
    %c0_i32 = arith.constant 0 : i32
    %c0_i32_0 = arith.constant 0 : i32
    %c0_i32_1 = arith.constant 0 : i32
    %c0_i32_2 = arith.constant 0 : i32
    return %c0_i32, %c0_i32_0, %c0_i32_1 : i32, i32, i32
  }
  func.func @transform_11(%arg0: i32) -> (i32, i32, i32) {
    %c0_i32 = arith.constant 0 : i32
    %c0_i32_0 = arith.constant 0 : i32
    %c0_i32_1 = arith.constant 0 : i32
    %c0_i32_2 = arith.constant 0 : i32
    return %c0_i32, %c0_i32_0, %c0_i32_1 : i32, i32, i32
  }
  func.func @transform_12(%arg0: i32) -> (i32, i32, i32) {
    %c0_i32 = arith.constant 0 : i32
    %c0_i32_0 = arith.constant 0 : i32
    %c0_i32_1 = arith.constant 0 : i32
    %c0_i32_2 = arith.constant 0 : i32
    return %c0_i32, %c0_i32_0, %c0_i32_1 : i32, i32, i32
  }
  func.func @transform_13(%arg0: i32) -> (i32, i32, i32) {
    %c0_i32 = arith.constant 0 : i32
    %c0_i32_0 = arith.constant 0 : i32
    %c0_i32_1 = arith.constant 0 : i32
    %c0_i32_2 = arith.constant 0 : i32
    return %c0_i32, %c0_i32_0, %c0_i32_1 : i32, i32, i32
  }
  func.func @transform_14(%arg0: i32) -> (i32, i32, i32) {
    %c0_i32 = arith.constant 0 : i32
    %c0_i32_0 = arith.constant 0 : i32
    %c0_i32_1 = arith.constant 0 : i32
    %c0_i32_2 = arith.constant 0 : i32
    return %c0_i32, %c0_i32_0, %c0_i32_1 : i32, i32, i32
  }
  func.func @transform_15(%arg0: i32) -> (i32, i32, i32) {
    %c0_i32 = arith.constant 0 : i32
    %c0_i32_0 = arith.constant 0 : i32
    %c0_i32_1 = arith.constant 0 : i32
    %c0_i32_2 = arith.constant 0 : i32
    return %c0_i32, %c0_i32_0, %c0_i32_1 : i32, i32, i32
  }
  func.func @transform_16(%arg0: i32) -> (i32, i32) {
    %c0_i32 = arith.constant 0 : i32
    %c0_i32_0 = arith.constant 0 : i32
    %c0_i32_1 = arith.constant 0 : i32
    return %c0_i32, %c0_i32_0 : i32, i32
  }
  func.func @transform_17(%arg0: i32) -> (i32, i32) {
    %c0_i32 = arith.constant 0 : i32
    %c0_i32_0 = arith.constant 0 : i32
    %c0_i32_1 = arith.constant 0 : i32
    return %c0_i32, %c0_i32_0 : i32, i32
  }
  func.func @transform_18(%arg0: i32) -> (i32, i32) {
    %c0_i32 = arith.constant 0 : i32
    %c0_i32_0 = arith.constant 0 : i32
    %c0_i32_1 = arith.constant 0 : i32
    return %c0_i32, %c0_i32_0 : i32, i32
  }
  func.func @transform_19(%arg0: i32) -> (i32, i32) {
    %c0_i32 = arith.constant 0 : i32
    %c0_i32_0 = arith.constant 0 : i32
    %c0_i32_1 = arith.constant 0 : i32
    return %c0_i32, %c0_i32_0 : i32, i32
  }
  func.func @transform_20(%arg0: i32) -> (i32, i32, i32) {
    %c0_i32 = arith.constant 0 : i32
    %c0_i32_0 = arith.constant 0 : i32
    %c0_i32_1 = arith.constant 0 : i32
    return %arg0, %c0_i32, %c0_i32_0 : i32, i32, i32
  }
}

</mosaic_0001>

<bundles_post_ra>
// kernel: sentiment_classifier_forward.1
= control target key start
LH: loop header
LB: loop body
LE: loop exit
PB: predicated region body
PF: predicated region fallthrough
CT: control target
= control target key end

     0   :  { %s5445_s0 = inlined_call_operand.vmem [shape: f32[2,8,128], index: 0, kind: input, shape index: {}]   ;;  %s5446_s1 = inlined_call_operand.vmem [shape: f32[2,1,8], index: 1, kind: input, shape index: {}]   ;;  %s5447_s2 = inlined_call_operand.vmem [shape: f32[1,128], index: 2, kind: input, shape index: {}]   ;;  %s5448_s3 = inlined_call_operand.vmem [shape: f32[1,128], index: 3, kind: input, shape index: {}]   ;;  %s5449_s4 = inlined_call_operand.vmem [shape: bf16[2,6,128,64], index: 4, kind: input, shape index: {}]   ;;  %s5450_s5 = inlined_call_operand.vmem [shape: f32[2,6,1,64], index: 5, kind: input, shape index: {}]   ;;  %s5451_s6 = inlined_call_operand.vmem [shape: bf16[2,2,64,128], index: 6, kind: input, shape index: {}]   ;;  %s5452_s7 = inlined_call_operand.vmem [shape: f32[2,1,128], index: 7, kind: input, shape index: {}]   ;;  %s5453_s8 = inlined_call_operand.vmem [shape: f32[2,1,128], index: 8, kind: input, shape index: {}]   ;;  %s5454_s9 = inlined_call_operand.vmem [shape: f32[2,1,128], index: 9, kind: input, shape index: {}]   ;;  %s5455_s10 = inlined_call_operand.vmem [shape: bf16[2,128,256], index: 10, kind: input, shape index: {}]   ;;  %s5456_s11 = inlined_call_operand.vmem [shape: f32[2,1,256], index: 11, kind: input, shape index: {}]   ;;  %s5457_s12 = inlined_call_operand.vmem [shape: bf16[2,256,128], index: 12, kind: input, shape index: {}]   ;;  %s5458_s13 = inlined_call_operand.vmem [shape: f32[2,1,128], index: 13, kind: input, shape index: {}]   ;;  %s5459_s14 = inlined_call_operand.vmem [shape: f32[2,1,128], index: 14, kind: input, shape index: {}]   ;;  %s5460_s15 = inlined_call_operand.vmem [shape: f32[2,1,128], index: 15, kind: input, shape index: {}]   ;;  %s5461_s16 = inlined_call_operand.vmem [shape: bf16[128,128], index: 16, kind: input, shape index: {}]   ;;  %s5462_s17 = inlined_call_operand.vmem [shape: f32[1,128], index: 17, kind: input, shape index: {}]   ;;  %s5463_s18 = inlined_call_operand.vmem [shape: bf16[128,128], index: 18, kind: input, shape index: {}]   ;;  %s5464_s19 = inlined_call_operand.vmem [shape: f32[1,128], index: 19, kind: input, shape index: {}]   ;;  %s5465_s20 = inlined_call_operand.hbm [shape: f32[2,1,128], index: 20, kind: output, shape index: {}]  }
   0x1   :  { %5477 = sst [smem:[#allocation12_spill]] %s5445_s0 }
   0x2   :  { %5478 = sst [smem:[#allocation13_spill]] %s5446_s1 }
   0x3   :  { %5479 = sst [smem:[#allocation14_spill]] %s5447_s2 }
   0x4   :  { %5480 = sst [smem:[#allocation15_spill]] %s5448_s3 }
   0x5   :  { %5481 = sst [smem:[#allocation16_spill]] %s5449_s4 }
   0x6   :  { %5482 = sst [smem:[#allocation17_spill]] %s5450_s5 }
   0x7   :  { %5483 = sst [smem:[#allocation18_spill]] %s5451_s6 }
   0x8   :  { %5484 = sst [smem:[#allocation19_spill]] %s5452_s7 }
   0x9   :  { %5485 = sst [smem:[#allocation20_spill]] %s5464_s19 }
   0xa   :  { %5486 = sst [smem:[#allocation21_spill]] %s5465_s20 }
   0xb   :  { %25 = vsyncpa [#allocation3], 0 }
   0xc   :  { %27 = vsyncpa [#allocation3 + $0x1], 0  ;;  %s4500_s1 = smov 0   ;;  %s4502_s22 = smov 0  }
   0xd   :  { %s4504_s23 = smov 0   ;;  %s4506_s24 = smov 0  }
   0xe LB: > { %5487 = sst [smem:[#allocation5_spill]] %s4380_s1  ;;  %s4521_s2 = sadd.s32 4294967295, %s4392_s24   ;;  %s4392_s24 = sphi %s4506_s24, %s5511_s24   ;;  %s4388_s23 = sphi %s4504_s23, %s5513_s23   ;;  %s4384_s22 = sphi %s4502_s22, %s5515_s22   ;;  %s4380_s1 = sphi %s4500_s1, %s5514_s1  }
   0xf   : > { %5488 = sst [smem:[#allocation6_spill]] %s4388_s23  ;;  %s3073_s25 = sadd.s32 4294967294, %s4392_s24  }
  0x10   : > { %5489 = sst [smem:[#allocation7_spill]] %s4392_s24  ;;  %s4525_s3 = sadd.s32 1, %s4392_s24  }
  0x11   : > { %5490 = sst [smem:[#allocation8_spill]] %s4525_s3  ;;  %s470_s26 = sadd.s32 1, %s4388_s23 }
  0x12   : > { %s467_s27 = ssub.s32 %s4392_s24, %s4525_s3  ;;  %p480_p0 = scmp.ne.s32.totalorder %s4388_s23, %s4384_s22 }
  0x13   : > { %p468_p1 = scmp.eq.s32.totalorder %s467_s27, 0  ;;  %p481_p2 = scmp.eq.s32.totalorder %s4521_s2, 1 }
  0x14   : > { %p486_p3 = scmp.ne.s32.totalorder %s4384_s22, %s4380_s1  ;;  %p487_p4 = scmp.eq.s32.totalorder %s3073_s25, 1 }
  0x15   : > { %s4536_s28 = scalar_select %p468_p1, %s4388_s23, %s470_s26  }
  0x16   : > { %p4538_p5 = por %p481_p2, %p480_p0  ;;  %p4542_p6 = por %p487_p4, %p486_p3 }
  0x17   : > { %5491 = sst [smem:[#allocation9_spill]] %s4536_s28  ;;  %p3076_p7 = scmp.ge.s32.totalorder %s4392_s24, 1 }
  0x18   : > { %s5492_s4 = scalar_select %p4538_p5, 1, 0 }
  0x19   : > { %s5494_s29 = scalar_select %p4542_p6, 1, 0 }
  0x1a   : > { %5493 = sst [smem:[#allocation10_spill]] %s5492_s4  ;;  %p572_p8 = scmp.lt.s32.totalorder %s4392_s24, 3 }
  0x1b   : > { %5495 = sst [smem:[#allocation11_spill]] %s5494_s29 }
  0x1c   : > { %p573_p9 = pnand %p3076_p7, %p572_p8 }
  0x1d   : > { %p631_p10 = scmp.lt.s32.totalorder (!%p573_p9), %s4521_s2, 1  ;;  %s5496_s26 = sld [smem:[#allocation13_spill]] (!%p573_p9) }
  0x1e   : > { %576 = sbr.rel (%p573_p9) target bundleno = 3842 (0xf02), region = 100  ;;  %s5497_s3 = sld [smem:[#allocation12_spill]] (!%p573_p9) }
  0x1f   : > { %s5498_s19 = sld [smem:[#allocation16_spill]] (!%p573_p9)  ;;  %s629_s28 = sand.u32 (!%p573_p9), 1, %s4384_s22  }
  0x20   : > { %s5499_s1 = sld [smem:[#allocation14_spill]] (!%p573_p9) }
  0x21   : > { %s5500_s4 = sld [smem:[#allocation15_spill]] (!%p573_p9) }
  0x22   : > { %s5501_s5 = sld [smem:[#allocation17_spill]] (!%p573_p9) }
  0x23   : > { %s4550_s30 = scalar_select %p631_p10, %s4521_s2, 1  ;;  %v4394_v1 = vmov 128.0   ;;  %vm1169_vm4 = vcmask 523264   ;;  %vm1245_vm5 = vcmask 1043456   ;;  %vm1215_vm6 = vcmask 64512  }
  0x24   : > { %4292 = vrcp.f32 %v4394_v1  ;;  %s5502_s6 = sld [smem:[#allocation18_spill]] }
  0x25   : > { %s3077_s0 = sshll.u32 %s4550_s30, 3  ;;  %s637_s27 = scalar_lea.vmem %s5496_s26, %s4550_s30  ;;  %v4040_v2 = vld [vmem:[%s5498_s19 + $0x38] sm:$0xff]  ;;  %v4039_v4 = vld [vmem:[%s5498_s19 + $0x30] sm:$0xff]  ;;  %v4038_v9 = vld [vmem:[%s5498_s19 + $0x28] sm:$0xff] }
  0x26   : > { %s634_s29 = scalar_lea.vmem %s5497_s3, %s3077_s0  ;;  %v4048_v3 = vld [vmem:[%s5498_s19 + $0x78] sm:$0xff]  ;;  %847 = vmatpush.bf16.msra.mxu0 %v4040_v2  ;;  %v4047_v5 = vld [vmem:[%s5498_s19 + $0x70] sm:$0xff]  ;;  %v4046_v10 = vld [vmem:[%s5498_s19 + $0x68] sm:$0xff]  ;;  %s5503_s7 = sld [smem:[#allocation19_spill]] }
  0x27   : > { %v640_v0 = vld [vmem:[%s634_s29] sm:$0xff]  ;;  %908 = vmatpush.bf16.msra.mxu1 %v4048_v3  ;;  %v4056_v6 = vld [vmem:[%s5498_s19 + $0xb8] sm:$0xff]  ;;  %v4055_v24 = vld [vmem:[%s5498_s19 + $0xb0] sm:$0xff]  ;;  %s5504_s24 = sld [smem:[#allocation21_spill]] }
  0x28   : > { %643 = vadd.xlane.f32.xlu0 %v640_v0  ;;  %v4064_v7 = vld [vmem:[%s5498_s19 + $0xf8] sm:$0xff]  ;;  %969 = vmatpush.bf16.msra.mxu2 %v4056_v6  ;;  %v4037_v12 = vld [vmem:[%s5498_s19 + $0x20] sm:$0xff]  ;;  %v4063_v25 = vld [vmem:[%s5498_s19 + $0xf0] sm:$0xff]  ;;  %s5507_s30 = sld [smem:[#allocation20_spill]] }
  0x29   : > { %1030 = vmatpush.bf16.msra.mxu3 %v4064_v7  ;;  %v4045_v13 = vld [vmem:[%s5498_s19 + $0x60] sm:$0xff]  ;;  %v4036_v22 = vld [vmem:[%s5498_s19 + $0x18] sm:$0xff]  ;;  %v4035_v26 = vld [vmem:[%s5498_s19 + $0x10] sm:$0xff] }
  0x2a   : > { %v4293_v8 = vpop.eup %4292  ;;  %848 = vmatpush.bf16.msra.mxu0 %v4039_v4  ;;  %v4044_v23 = vld [vmem:[%s5498_s19 + $0x58] sm:$0xff]  ;;  %v4043_v27 = vld [vmem:[%s5498_s19 + $0x50] sm:$0xff]  ;;  %v4054_v28 = vld [vmem:[%s5498_s19 + $0xa8] sm:$0xff] }
  0x2b   : > { %909 = vmatpush.bf16.msra.mxu1 %v4047_v5  ;;  %v646_v11 = vmul.f32 128.0, %v4293_v8  ;;  %vm650_vm0 = vweird.f32 %v4293_v8  ;;  %v4062_v29 = vld [vmem:[%s5498_s19 + $0xe8] sm:$0xff]  ;;  %v4053_v32 = vld [vmem:[%s5498_s19 + $0xa0] sm:$0xff]  ;;  %v4052_v36 = vld [vmem:[%s5498_s19 + $0x98] sm:$0xff] }
  0x2c   : > { %970 = vmatpush.bf16.msra.mxu2 %v4055_v24  ;;  %v4034_v30 = vld [vmem:[%s5498_s19 + $0x8] sm:$0xff]  ;;  %v4061_v33 = vld [vmem:[%s5498_s19 + $0xe0] sm:$0xff]  ;;  %v4060_v37 = vld [vmem:[%s5498_s19 + $0xd8] sm:$0xff] }
  0x2d   : > { %v647_v14 = vsub.f32 1.0, %v646_v11  ;;  %1031 = vmatpush.bf16.msra.mxu3 %v4063_v25  ;;  %v4042_v31 = vld [vmem:[%s5498_s19 + $0x48] sm:$0xff]  ;;  %v4033_v34 = vld [vmem:[%s5498_s19] sm:$0xff]  ;;  %v4072_v38 = vld [vmem:[%s5498_s19 + $0x138] sm:$0xff]  ;;  %s5505_s20 = smov %s5504_s24  ;;  %s3005_s0 = scalar_lea.hbm %s5504_s24, %s4521_s2 }
  0x2e   : > { %849 = vmatpush.bf16.msra.mxu0 %v4038_v9  ;;  %v4041_v35 = vld [vmem:[%s5498_s19 + $0x40] sm:$0xff]  ;;  %v4080_v39 = vld [vmem:[%s5498_s19 + $0x178] sm:$0xff]  ;;  %v4051_v40 = vld [vmem:[%s5498_s19 + $0x90] sm:$0xff]  ;;  %s3009_s3 = sshll.u32 %s3005_s0, 4  ;;  %s3010_s3 = int_to_ptr.hbm [resolvable:$true] %s3009_s3 }
  0x2f   : > { %910 = vmatpush.bf16.msra.mxu1 %v4046_v10  ;;  %v648_v15 = vmul.f32 %v4293_v8, %v647_v14  ;;  %v4059_v41 = vld [vmem:[%s5498_s19 + $0xd0] sm:$0xff]  ;;  %v4050_v44 = vld [vmem:[%s5498_s19 + $0x88] sm:$0xff]  ;;  %v4049_v48 = vld [vmem:[%s5498_s19 + $0x80] sm:$0xff] }
  0x30   : > { %971 = vmatpush.bf16.msra.mxu2 %v4054_v28  ;;  %v4071_v42 = vld [vmem:[%s5498_s19 + $0x130] sm:$0xff]  ;;  %v4058_v45 = vld [vmem:[%s5498_s19 + $0xc8] sm:$0xff]  ;;  %v4057_v49 = vld [vmem:[%s5498_s19 + $0xc0] sm:$0xff] }
  0x31   : > { %v649_v16 = vadd.f32 %v4293_v8, %v648_v15  ;;  %1032 = vmatpush.bf16.msra.mxu3 %v4062_v29  ;;  %v4079_v43 = vld [vmem:[%s5498_s19 + $0x170] sm:$0xff]  ;;  %v4070_v46 = vld [vmem:[%s5498_s19 + $0x128] sm:$0xff]  ;;  %v4069_v50 = vld [vmem:[%s5498_s19 + $0x120] sm:$0xff] }
  0x32   : > { %850 = vmatpush.bf16.msra.mxu0 %v4037_v12  ;;  %v4078_v47 = vld [vmem:[%s5498_s19 + $0x168] sm:$0xff]  ;;  %v4077_v51 = vld [vmem:[%s5498_s19 + $0x160] sm:$0xff]  ;;  %v4068_v52 = vld [vmem:[%s5498_s19 + $0x118] sm:$0xff] }
  0x33   : > { %911 = vmatpush.bf16.msra.mxu1 %v4045_v13  ;;  %v4590_v17 = vsel %vm650_vm0, %v4293_v8, %v649_v16  ;;  %v4076_v53 = vld [vmem:[%s5498_s19 + $0x158] sm:$0xff]  ;;  %v4067_v56 = vld [vmem:[%s5498_s19 + $0x110] sm:$0xff]  ;;  %v4066_v59 = vld [vmem:[%s5498_s19 + $0x108] sm:$0xff] }
  0x34   : > { %972 = vmatpush.bf16.msra.mxu2 %v4053_v32  ;;  %v4075_v57 = vld [vmem:[%s5498_s19 + $0x150] sm:$0xff]  ;;  %v4074_v60 = vld [vmem:[%s5498_s19 + $0x148] sm:$0xff]  ;;  %v4065_v61 = vld [vmem:[%s5498_s19 + $0x100] sm:$0xff] }
  0x35   : > { %1033 = vmatpush.bf16.msra.mxu3 %v4061_v33  ;;  %v4073_v62 = vld [vmem:[%s5498_s19 + $0x140] sm:$0xff] }
  0x36   : > { %851 = vmatpush.bf16.msra.mxu0 %v4036_v22  ;;  %v4266_v5 = vld [vmem:[%s5499_s1] ss:$0 sm:$0xff]  ;;  %v4270_v14 = vld [vmem:[%s5501_s5 + $0x2] ss:$0 sm:$0xff]  ;;  %v4271_v15 = vld [vmem:[%s5501_s5 + $0x3] ss:$0 sm:$0xff] }
  0x37   : > { %912 = vmatpush.bf16.msra.mxu1 %v4044_v23  ;;  %v4267_v7 = vld [vmem:[%s5500_s4] ss:$0 sm:$0xff]  ;;  %v4269_v24 = vld [vmem:[%s5501_s5 + $0x1] ss:$0 sm:$0xff]  ;;  %v4272_v29 = vld [vmem:[%s5501_s5 + $0x4] ss:$0 sm:$0xff] }
  0x38   : > { %973 = vmatpush.bf16.msra.mxu2 %v4052_v36  ;;  %v4268_v23 = vld [vmem:[%s5501_s5] ss:$0 sm:$0xff]  ;;  %s4350_s1 = scalar_lea.hbm %s5505_s20, 2 }
  0x39   : > { %1034 = vmatpush.bf16.msra.mxu3 %v4060_v37 }
  0x3a   : > { %852 = vmatpush.bf16.msra.mxu0 %v4035_v26 }
  0x3b   : > { %913 = vmatpush.bf16.msra.mxu1 %v4043_v27 }
  0x3c   : > { %974 = vmatpush.bf16.msra.mxu2 %v4051_v40 }
  0x3d   : > { %1035 = vmatpush.bf16.msra.mxu3 %v4059_v41 }
  0x3e   : > { %853 = vmatpush.bf16.msra.mxu0 %v4034_v30  ;;  %v4273_v30 = vld [vmem:[%s5501_s5 + $0x5] ss:$0 sm:$0xff] }
  0x3f   : > { %914 = vmatpush.bf16.msra.mxu1 %v4042_v31 }
  0x40   : > { %975 = vmatpush.bf16.msra.mxu2 %v4050_v44 }
  0x41   : > { %1036 = vmatpush.bf16.msra.mxu3 %v4058_v45 }
  0x42   : > { %854 = vmatpush.bf16.msra.mxu0 %v4033_v34 }
  0x43   : > { %915 = vmatpush.bf16.msra.mxu1 %v4041_v35 }
  0x44   : > { %976 = vmatpush.bf16.msra.mxu2 %v4049_v48 }
  0x45   : > { %1037 = vmatpush.bf16.msra.mxu3 %v4057_v49 }
  0x46   : > { %1091 = vmatpush.bf16.msrb.mxu0 %v4072_v38 }
  0x47   : > { %1152 = vmatpush.bf16.msrb.mxu1 %v4080_v39 }
  0x4a   : > { %1092 = vmatpush.bf16.msrb.mxu0 %v4071_v42 }
  0x4b   : > { %1153 = vmatpush.bf16.msrb.mxu1 %v4079_v43 }
  0x4e   : > { %1093 = vmatpush.bf16.msrb.mxu0 %v4070_v46 }
  0x4f   : > { %1154 = vmatpush.bf16.msrb.mxu1 %v4078_v47  ;;  %v4752_v47 = vld [vmem:[%s637_s27] ss:$0 sm:$0xff]  ;;  %s630_s27 = scalar_lea.vmem [#allocation2], %s629_s28 }
  0x50   : > { %s3007_s23 = sshll.u32 %s630_s27, 4  ;;  %s3008_s23 = int_to_ptr.vmem [resolvable:$true] %s3007_s23 }
  0x52   : > { %1094 = vmatpush.bf16.msrb.mxu0 %v4069_v50 }
  0x53   : > { %1155 = vmatpush.bf16.msrb.mxu1 %v4077_v51 }
  0x56   : > { %1095 = vmatpush.bf16.msrb.mxu0 %v4068_v52 }
  0x57   : > { %1156 = vmatpush.bf16.msrb.mxu1 %v4076_v53 }
  0x5a   : > { %1096 = vmatpush.bf16.msrb.mxu0 %v4067_v56 }
  0x5b   : > { %1157 = vmatpush.bf16.msrb.mxu1 %v4075_v57 }
  0x5e   : > { %1097 = vmatpush.bf16.msrb.mxu0 %v4066_v59 }
  0x5f   : > { %1158 = vmatpush.bf16.msrb.mxu1 %v4074_v60 }
  0x62   : > { %1098 = vmatpush.bf16.msrb.mxu0 %v4065_v61 }
  0x63   : > { %1159 = vmatpush.bf16.msrb.mxu1 %v4073_v62 }
  0x9b   : > { %v644_v18 = vpop.xlane.xlu0 %643 }
  0x9c   : > { %v652_v19 = vmul.f32 %v4590_v17, %v644_v18 }
  0x9e   : > { %v4593_v20 = vsub.f32 %v640_v0, %v652_v19 }
  0xa0   : > { %v654_v21 = vmul.f32 %v4593_v20, %v4593_v20 }
  0xa2   : > { %655 = vadd.xlane.f32.xlu0 %v654_v21 }
 0x115   : > { %v656_v54 = vpop.xlane.xlu0 %655 }
 0x116   : > { %v657_v55 = vmul.f32 %v656_v54, %v4590_v17 }
 0x118   : > { %v658_v58 = vadd.f32 1e-12, %v657_v55 }
 0x11a   : > { %4294 = vrsqrt.f32 %v658_v58  ;;  %vm665_vm2 = vweird.f32 %v658_v58 }
 0x120   : > { %v4295_v63 = vpop.eup %4294 }
 0x121   : > { %v660_v0 = vmul.f32 %v4295_v63, %v658_v58  ;;  %vm666_vm1 = vweird.f32 %v4295_v63 }
 0x122   : > { %vm667_vm3 = vmor %vm665_vm2, %vm666_vm1 }
 0x123   : > { %v661_v1 = vmul.f32 %v4295_v63, %v660_v0 }
 0x125   : > { %v662_v2 = vmul.f32 0.5, %v661_v1 }
 0x127   : > { %v663_v3 = vsub.f32 1.5, %v662_v2 }
 0x129   : > { %v664_v4 = vmul.f32 %v4295_v63, %v663_v3 }
 0x12b   : > { %v668_v6 = vsel %vm667_vm3, %v4295_v63, %v664_v4  ;;  %v4084_v4 = vld [vmem:[%s5502_s6 + $0x18] sm:$0xff] }
 0x12c   : > { %v669_v8 = vmul.f32 %v668_v6, %v4593_v20  ;;  %v4083_v6 = vld [vmem:[%s5502_s6 + $0x10] sm:$0xff] }
 0x12e   : > { %v673_v9 = vmul.f32 %v4266_v5, %v669_v8  ;;  %v4088_v5 = vld [vmem:[%s5502_s6 + $0x38] sm:$0xff] }
 0x130   : > { %v4719_v10 = vadd.f32 %v4267_v7, %v673_v9  ;;  %v4082_v7 = vld [vmem:[%s5502_s6 + $0x8] sm:$0xff] }
 0x132   : > { %v678_v11 = vpack.c.bf16 %v4719_v10, %v4719_v10 }
 0x134   : > { %855 = vmatmul.bf16.vlgmr.msra.gmra.mxu0 %v678_v11  ;;  %916 = vmatmul.bf16.vlgmr.msra.gmra.mxu1 %v678_v11 }
 0x135   : > { %977 = vmatmul.bf16.vlgmr.msra.gmra.mxu2 %v678_v11  ;;  %1038 = vmatmul.bf16.vlgmr.msra.gmra.mxu3 %v678_v11 }
 0x144   : > { %1099 = vmatmul.bf16.vlgmr.msrb.gmra.mxu0 %v678_v11  ;;  %1160 = vmatmul.bf16.vlgmr.msrb.gmra.mxu1 %v678_v11 }
 0x1b1   : > { %v856_v12 = vpop.f32.mrf.mxu0  ;;  %v917_v13 = vpop.f32.mrf.mxu1 }
 0x1b2   : > { %v857_v31 = vadd.f32 %v4268_v23, %v856_v12  ;;  %v918_v32 = vadd.f32 %v4269_v24, %v917_v13 }
 0x1b4   : > { %v1165_v39 = vpack.c.bf16 %v857_v31, %v857_v31  ;;  %v1166_v40 = vpack.c.bf16 %v918_v32, %v918_v32 }
 0x1b8   : > { %v978_v16 = vpop.f32.mrf.mxu2  ;;  %v1039_v18 = vpop.f32.mrf.mxu3 }
 0x1b9   : > { %v979_v19 = vadd.f32 %v4270_v14, %v978_v16  ;;  %v1040_v20 = vadd.f32 %v4271_v15, %v1039_v18  ;;  %v858_v21 = vpop.f32.mrf.mxu0  ;;  %v919_v22 = vpop.f32.mrf.mxu1  ;;  %v4081_v18 = vld [vmem:[%s5502_s6] sm:$0xff] }
 0x1ba   : > { %v4085_v21 = vld [vmem:[%s5502_s6 + $0x20] sm:$0xff] }
 0x1bb   : > { %v1167_v25 = vpack.c.bf16 %v979_v19, %v979_v19  ;;  %v1168_v26 = vpack.c.bf16 %v1040_v20, %v1040_v20  ;;  %v4087_v19 = vld [vmem:[%s5502_s6 + $0x30] sm:$0xff]  ;;  %v4086_v20 = vld [vmem:[%s5502_s6 + $0x28] sm:$0xff] }
 0x1bd   : > { %v1174_v27 = vsel %vm1169_vm4, %v1167_v25, 0  ;;  %v1193_v28 = vsel %vm1169_vm4, %v1168_v26, 0 }
 0x1be   : > { %1183 = vmatpush.bf16.xpose.msrb.mxu2 %v1174_v27  ;;  %1202 = vmatpush.bf16.xpose.msrb.mxu3 %v1193_v28 }
 0x1c0   : > { %v980_v33 = vpop.f32.mrf.mxu2  ;;  %v1041_v34 = vpop.f32.mrf.mxu3 }
 0x1c1   : > { %v1100_v35 = vpop.f32.mrf.mxu0  ;;  %v1161_v36 = vpop.f32.mrf.mxu1 }
 0x1c2   : > { %v1101_v37 = vadd.f32 %v4272_v29, %v1100_v35  ;;  %v1162_v38 = vadd.f32 %v4273_v30, %v1161_v36  ;;  %v4274_v29 = vld [vmem:[%s5503_s7] ss:$0 sm:$0xff]  ;;  %v3366_v36 = vld [vmem:[%s5455_s10 + $0x70] sm:$0xf] }
 0x1c4   : > { %v1240_v41 = vpack.c.bf16 %v1101_v37, %v1101_v37  ;;  %v1241_v42 = vpack.c.bf16 %v1162_v38, %v1162_v38  ;;  %v4104_v37 = vld [vmem:[%s5455_s10 + $0x74] sm:$0xf0]  ;;  %v4103_v38 = vld [vmem:[%s5455_s10 + $0x74] sm:$0xf] }
 0x1c5   : > { %3270 = vmatmul.msk.bf16.vlgmr.msrb.gmra.mxu2 %vm1169_vm4, %v1165_v39  ;;  %3271 = vmatmul.msk.bf16.vlgmr.msrb.gmra.mxu3 %vm1169_vm4, %v1166_v40  ;;  %v3367_v39 = vor.u32 %v4104_v37, %v3366_v36  ;;  %v3368_v40 = vld [vmem:[%s5455_s10 + $0x78] sm:$0xf0]  ;;  %v4275_v37 = vld [vmem:[%s5453_s8] ss:$0 sm:$0xff] }
 0x1c6   : > { %v1247_v43 = vsel %vm1245_vm5, %v1240_v41, 0  ;;  %v1266_v44 = vsel %vm1245_vm5, %v1241_v42, 0 }
 0x1c7   : > { %1256 = vmatpush.bf16.msra.mxu2 %v1247_v43  ;;  %1275 = vmatpush.bf16.msra.mxu3 %v1266_v44 }
 0x1c9   : > { %v1102_v45 = vpop.f32.mrf.mxu0  ;;  %v1163_v46 = vpop.f32.mrf.mxu1 }
 0x1ca   : > { %v3358_v45 = vld [vmem:[%s5455_s10 + $0x60] sm:$0xf]  ;;  %v4102_v46 = vld [vmem:[%s5455_s10 + $0x64] sm:$0xf0] }
 0x1cb   : > { %1330 = vmatpush.bf16.msrb.mxu2 %v4084_v4  ;;  %1370 = vmatpush.bf16.msrb.mxu3 %v4088_v5  ;;  %v3336_v4 = vld [vmem:[%s5455_s10 + $0x38] sm:$0xf0] }
 0x1cf   : > { %1331 = vmatpush.bf16.msrb.mxu2 %v4083_v6  ;;  %1371 = vmatpush.bf16.msrb.mxu3 %v4087_v19  ;;  %v3326_v6 = vld [vmem:[%s5455_s10 + $0x20] sm:$0xf] }
 0x1d3   : > { %1332 = vmatpush.bf16.msrb.mxu2 %v4082_v7  ;;  %1372 = vmatpush.bf16.msrb.mxu3 %v4086_v20  ;;  %v4094_v7 = vld [vmem:[%s5455_s10 + $0x24] sm:$0xf0]  ;;  %v3310_v20 = vld [vmem:[%s5455_s10] sm:$0xf] }
 0x1d7   : > { %1333 = vmatpush.bf16.msrb.mxu2 %v4081_v18  ;;  %1373 = vmatpush.bf16.msrb.mxu3 %v4085_v21  ;;  %v3320_v18 = vld [vmem:[%s5455_s10 + $0x18] sm:$0xf0]  ;;  %v4090_v21 = vld [vmem:[%s5455_s10 + $0x4] sm:$0xf0] }
 0x248   : > { %v1185_v48 = vpop.f32.mrf.mxu2  ;;  %v1204_v49 = vpop.f32.mrf.mxu3 }
 0x249   : > { %v1208_v50 = vmul.f32 0.125, %v1185_v48  ;;  %v1209_v52 = vmul.f32 0.125, %v1204_v49  ;;  %v4101_v48 = vld [vmem:[%s5455_s10 + $0x64] sm:$0xf]  ;;  %v3359_v49 = vor.u32 %v4102_v46, %v3358_v45  ;;  %v4110_v45 = vld [vmem:[%s5457_s12 + $0x28] sm:$0xff] }
 0x24a   : > { %v4118_v46 = vld [vmem:[%s5457_s12 + $0x68] sm:$0xff] }
 0x24b   : > { %v1213_v51 = vadd.f32 %v4752_v47, %v1208_v50  ;;  %v1214_v56 = vadd.f32 %v4752_v47, %v1209_v52  ;;  %v3360_v50 = vld [vmem:[%s5455_s10 + $0x68] sm:$0xf0]  ;;  %v3350_v52 = vld [vmem:[%s5455_s10 + $0x50] sm:$0xf] }
 0x24d   : > { %v1216_v53 = vsel %vm1215_vm6, %v1213_v51, -inf  ;;  %v1219_v57 = vsel %vm1215_vm6, %v1214_v56, -inf }
 0x24e   : > { %1217 = vmax.xlane.f32.xlu1 %v1216_v53  ;;  %v4100_v53 = vld [vmem:[%s5455_s10 + $0x54] sm:$0xf0] }
 0x250   : > { %v1187_v54 = vpop.f32.mrf.mxu2  ;;  %v1206_v55 = vpop.f32.mrf.mxu3 }
 0x251   : > { %v4099_v54 = vld [vmem:[%s5455_s10 + $0x54] sm:$0xf]  ;;  %v3351_v55 = vor.u32 %v4100_v53, %v3350_v52 }
 0x252   : > { %v4107_v52 = vld [vmem:[%s5457_s12 + $0x10] sm:$0xff] }
 0x253   : > { %v4115_v53 = vld [vmem:[%s5457_s12 + $0x50] sm:$0xff] }
 0x256   : > { %1220 = vmax.xlane.f32.xlu1 %v1219_v57 }
 0x2c1   : > { %v1218_v58 = vpop.xlane.xlu1 %1217 }
 0x2c2   : > { %v1222_v59 = vsub.f32 %v1213_v51, %v1218_v58  ;;  %v3363_v51 = vor.u32 %v4101_v48, %v3360_v50  ;;  %v3342_v58 = vld [vmem:[%s5455_s10 + $0x40] sm:$0xf]  ;;  %v4108_v50 = vld [vmem:[%s5457_s12 + $0x18] sm:$0xff] }
 0x2c3   : > { %v4109_v48 = vld [vmem:[%s5457_s12 + $0x20] sm:$0xff] }
 0x2c4   : > { %v1224_v60 = vmul.f32 1.442695, %v1222_v59  ;;  %v4098_v59 = vld [vmem:[%s5455_s10 + $0x44] sm:$0xf0] }
 0x2c6   : > { %4296 = vpow2.f32 %v1224_v60  ;;  %v4097_v60 = vld [vmem:[%s5455_s10 + $0x44] sm:$0xf] }
 0x2c9   : > { %v1221_v61 = vpop.xlane.xlu1 %1220 }
 0x2ca   : > { %v1223_v62 = vsub.f32 %v1214_v56, %v1221_v61  ;;  %v3352_v56 = vld [vmem:[%s5455_s10 + $0x58] sm:$0xf0]  ;;  %v3343_v61 = vor.u32 %v4098_v59, %v3342_v58  ;;  %v1432_v58 = vld [vmem:[%s5456_s11] sm:$0x3] }
 0x2cb   : > { %v3355_v57 = vor.u32 %v4099_v54, %v3352_v56  ;;  %v4106_v54 = vld [vmem:[%s5457_s12 + $0x8] sm:$0xff]  ;;  %v4105_v56 = vld [vmem:[%s5457_s12] sm:$0xff]  ;;  %v1435_v59 = vperm.slane %v1432_v58, 0 }
 0x2cc   : > { %v4297_v63 = vpop.eup %4296  ;;  %v1226_v0 = vmul.f32 1.442695, %v1223_v62  ;;  %v3344_v62 = vld [vmem:[%s5455_s10 + $0x48] sm:$0xf0] }
 0x2cd   : > { %v1228_v1 = vsel %vm1215_vm6, %v4297_v63, 0.0 }
 0x2ce   : > { %4298 = vpow2.f32 %v1226_v0  ;;  %1229 = vadd.xlane.f32.xlu2 %v1228_v1  ;;  %v3334_v0 = vld [vmem:[%s5455_s10 + $0x30] sm:$0xf]  ;;  %v4096_v1 = vld [vmem:[%s5455_s10 + $0x34] sm:$0xf0] }
 0x2d4   : > { %v4299_v2 = vpop.eup %4298 }
 0x2d5   : > { %v1231_v3 = vsel %vm1215_vm6, %v4299_v2, 0.0 }
 0x2d6   : > { %1232 = vadd.xlane.f32.xlu2 %v1231_v3  ;;  %v3335_v3 = vor.u32 %v4096_v1, %v3334_v0 }
 0x341   : > { %v1230_v8 = vpop.xlane.xlu2 %1229 }
 0x342   : > { %4300 = vrcp.f32 %v1230_v8  ;;  %v4093_v8 = vld [vmem:[%s5455_s10 + $0x24] sm:$0xf] }
 0x348   : > { %v4301_v9 = vpop.eup %4300 }
 0x349   : > { %v1236_v11 = vmul.f32 %v4301_v9, %v4297_v63  ;;  %v1233_v12 = vpop.xlane.xlu2 %1232  ;;  %v3347_v63 = vor.u32 %v4097_v60, %v3344_v62  ;;  %v3327_v9 = vor.u32 %v4094_v7, %v3326_v6  ;;  %v1436_v60 = vperm.slane %v1432_v58, 1  ;;  %v4149_v58 = vld [vmem:[%s5498_s19 + $0x260] sm:$0xff] }
 0x34a   : > { %4302 = vrcp.f32 %v1233_v12 }
 0x34b   : > { %v1238_v13 = vpack.c.bf16 %v1236_v11, %v1236_v11  ;;  %v3328_v11 = vld [vmem:[%s5455_s10 + $0x28] sm:$0xf0] }
 0x34c   : > { %v3331_v12 = vor.u32 %v4093_v8, %v3328_v11 }
 0x34d   : > { %3272 = vmatmul.msk.bf16.vlgmr.msra.gmra.mxu2 %vm1215_vm6, %v1238_v13  ;;  %v3318_v13 = vld [vmem:[%s5455_s10 + $0x10] sm:$0xf] }
 0x34e   : > { %1519 = vmatpush.bf16.msra.mxu2 %v3367_v39 }
 0x350   : > { %v4303_v14 = vpop.eup %4302 }
 0x351   : > { %v1237_v15 = vmul.f32 %v4303_v14, %v4299_v2  ;;  %v4095_v2 = vld [vmem:[%s5455_s10 + $0x34] sm:$0xf]  ;;  %v4092_v14 = vld [vmem:[%s5455_s10 + $0x14] sm:$0xf0] }
 0x352   : > { %1520 = vmatpush.bf16.msra.mxu2 %v3359_v49  ;;  %v3339_v5 = vor.u32 %v4095_v2, %v3336_v4  ;;  %v4117_v49 = vld [vmem:[%s5457_s12 + $0x60] sm:$0xff] }
 0x353   : > { %v1239_v16 = vpack.c.bf16 %v1237_v15, %v1237_v15  ;;  %v4091_v15 = vld [vmem:[%s5455_s10 + $0x14] sm:$0xf] }
 0x354   : > { %v3323_v19 = vor.u32 %v4091_v15, %v3320_v18 }
 0x355   : > { %3273 = vmatmul.msk.bf16.vlgmr.msra.gmra.mxu3 %vm1215_vm6, %v1239_v16  ;;  %v3319_v16 = vor.u32 %v4092_v14, %v3318_v13 }
 0x356   : > { %1521 = vmatpush.bf16.msra.mxu2 %v3351_v55  ;;  %v4114_v55 = vld [vmem:[%s5457_s12 + $0x48] sm:$0xff] }
 0x35a   : > { %1522 = vmatpush.bf16.msra.mxu2 %v3343_v61 }
 0x35e   : > { %1523 = vmatpush.bf16.msra.mxu2 %v3335_v3 }
 0x362   : > { %1524 = vmatpush.bf16.msra.mxu2 %v3327_v9 }
 0x366   : > { %1525 = vmatpush.bf16.msra.mxu2 %v3319_v16 }
 0x3d0   : > { %v1258_v22 = vpop.f32.mrf.mxu2 }
 0x3d1   : > { %v1281_v23 = vpack.c.bf16 %v1258_v22, %v1258_v22  ;;  %v4089_v22 = vld [vmem:[%s5455_s10 + $0x4] sm:$0xf] }
 0x3d3   : > { %3290 = vmatmul.msk.bf16.vlgmr.msrb.gmra.mxu2 %vm1169_vm4, %v1281_v23  ;;  %v3311_v23 = vor.u32 %v4090_v21, %v3310_v20 }
 0x3d5   : > { %1526 = vmatpush.bf16.msra.mxu2 %v3311_v23 }
 0x3d8   : > { %v1260_v24 = vpop.f32.mrf.mxu2  ;;  %v1277_v25 = vpop.f32.mrf.mxu3 }
 0x3d9   : > { %v1282_v26 = vpack.c.bf16 %v1277_v25, %v1277_v25  ;;  %v3312_v24 = vld [vmem:[%s5455_s10 + $0x8] sm:$0xf0] }
 0x3da   : > { %v3315_v25 = vor.u32 %v4089_v22, %v3312_v24 }
 0x3db   : > { %3307 = vmatmul.msk.bf16.vlgmr.msrb.gmra.mxu3 %vm1169_vm4, %v1282_v26  ;;  %v4112_v26 = vld [vmem:[%s5457_s12 + $0x38] sm:$0xff] }
 0x3dc   : > { %1697 = vmatpush.bf16.msra.mxu0 %v4112_v26 }
 0x3e0   : > { %v1279_v27 = vpop.f32.mrf.mxu3 }
 0x3e1   : > { %v4120_v27 = vld [vmem:[%s5457_s12 + $0x78] sm:$0xff] }
 0x3e2   : > { %1710 = vmatpush.bf16.msra.mxu1 %v4120_v27 }
 0x456   : > { %v1335_v28 = vpop.f32.mrf.mxu2 }
 0x45e   : > { %v1337_v30 = vpop.f32.mrf.mxu2  ;;  %v1375_v31 = vpop.f32.mrf.mxu3 }
 0x45f   : > { %v1379_v32 = vadd.f32 %v1375_v31, %v1335_v28 }
 0x461   : > { %v1384_v33 = vadd.f32 %v4274_v29, %v1379_v32 }
 0x463   : > { %v1385_v34 = vadd.f32 %v1384_v33, %v4719_v10  ;;  %v3371_v10 = vor.u32 %v4103_v38, %v3368_v40  ;;  %v4276_v40 = vld [vmem:[%s5454_s9] ss:$0 sm:$0xff] }
 0x465   : > { %1388 = vadd.xlane.f32.xlu0 %v1385_v34  ;;  %1532 = vmatpush.bf16.msra.mxu3 %v3371_v10 }
 0x466   : > { %v1377_v35 = vpop.f32.mrf.mxu3 }
 0x469   : > { %1533 = vmatpush.bf16.msra.mxu3 %v3363_v51  ;;  %v4116_v51 = vld [vmem:[%s5457_s12 + $0x58] sm:$0xff] }
 0x46d   : > { %1534 = vmatpush.bf16.msra.mxu3 %v3355_v57  ;;  %v4113_v57 = vld [vmem:[%s5457_s12 + $0x40] sm:$0xff] }
 0x471   : > { %1535 = vmatpush.bf16.msra.mxu3 %v3347_v63 }
 0x475   : > { %1536 = vmatpush.bf16.msra.mxu3 %v3339_v5 }
 0x479   : > { %1537 = vmatpush.bf16.msra.mxu3 %v3331_v12 }
 0x47d   : > { %1538 = vmatpush.bf16.msra.mxu3 %v3323_v19 }
 0x481   : > { %1539 = vmatpush.bf16.msra.mxu3 %v3315_v25  ;;  %v4277_v25 = vld [vmem:[%s5458_s13] ss:$0 sm:$0xff] }
 0x4d8   : > { %v1389_v41 = vpop.xlane.xlu0 %1388 }
 0x4d9   : > { %v1390_v42 = vmul.f32 %v1389_v41, %v4590_v17 }
 0x4db   : > { %v4805_v43 = vsub.f32 %v1385_v34, %v1390_v42 }
 0x4dd   : > { %v1392_v44 = vmul.f32 %v4805_v43, %v4805_v43 }
 0x4df   : > { %1393 = vadd.xlane.f32.xlu1 %v1392_v44  ;;  %v4111_v44 = vld [vmem:[%s5457_s12 + $0x30] sm:$0xff] }
 0x4e0   : > { %1698 = vmatpush.bf16.msra.mxu0 %v4111_v44 }
 0x4e4   : > { %1699 = vmatpush.bf16.msra.mxu0 %v4110_v45 }
 0x4e8   : > { %1700 = vmatpush.bf16.msra.mxu0 %v4109_v48  ;;  %v4132_v48 = vld [vmem:[%s5498_s19 + $0x1d8] sm:$0xff] }
 0x4ec   : > { %1701 = vmatpush.bf16.msra.mxu0 %v4108_v50  ;;  %v4151_v50 = vld [vmem:[%s5498_s19 + $0x270] sm:$0xff] }
 0x4f0   : > { %1702 = vmatpush.bf16.msra.mxu0 %v4107_v52  ;;  %v4131_v52 = vld [vmem:[%s5498_s19 + $0x1d0] sm:$0xff] }
 0x4f4   : > { %1703 = vmatpush.bf16.msra.mxu0 %v4106_v54  ;;  %v4150_v54 = vld [vmem:[%s5498_s19 + $0x268] sm:$0xff] }
 0x4f8   : > { %1704 = vmatpush.bf16.msra.mxu0 %v4105_v56  ;;  %v4130_v56 = vld [vmem:[%s5498_s19 + $0x1c8] sm:$0xff] }
 0x552   : > { %v1394_v28 = vpop.xlane.xlu1 %1393 }
 0x553   : > { %v1395_v29 = vmul.f32 %v1394_v28, %v4590_v17 }
 0x555   : > { %v1396_v30 = vadd.f32 1e-12, %v1395_v29 }
 0x557   : > { %4304 = vrsqrt.f32 %v1396_v30  ;;  %vm1403_vm8 = vweird.f32 %v1396_v30 }
 0x55d   : > { %v4305_v31 = vpop.eup %4304 }
 0x55e   : > { %v1398_v32 = vmul.f32 %v4305_v31, %v1396_v30  ;;  %vm1404_vm7 = vweird.f32 %v4305_v31 }
 0x55f   : > { %vm1405_vm9 = vmor %vm1403_vm8, %vm1404_vm7 }
 0x560   : > { %v1399_v33 = vmul.f32 %v4305_v31, %v1398_v32 }
 0x562   : > { %v1400_v34 = vmul.f32 0.5, %v1399_v33  ;;  %v4128_v33 = vld [vmem:[%s5498_s19 + $0x1b8] sm:$0xff] }
 0x563   : > { %1925 = vmatpush.bf16.msrb.mxu2 %v4128_v33 }
 0x564   : > { %v1401_v35 = vsub.f32 1.5, %v1400_v34  ;;  %v4136_v34 = vld [vmem:[%s5498_s19 + $0x1f8] sm:$0xff] }
 0x565   : > { %1986 = vmatpush.bf16.msrb.mxu3 %v4136_v34  ;;  %v4279_v34 = vld [vmem:[%s5460_s15] ss:$0 sm:$0xff] }
 0x566   : > { %v1402_v36 = vmul.f32 %v4305_v31, %v1401_v35  ;;  %v4127_v35 = vld [vmem:[%s5498_s19 + $0x1b0] sm:$0xff] }
 0x567   : > { %1926 = vmatpush.bf16.msrb.mxu2 %v4127_v35 }
 0x568   : > { %v1406_v38 = vsel %vm1405_vm9, %v4305_v31, %v1402_v36  ;;  %v4135_v36 = vld [vmem:[%s5498_s19 + $0x1f0] sm:$0xff] }
 0x569   : > { %v1407_v39 = vmul.f32 %v1406_v38, %v4805_v43  ;;  %v4119_v43 = vld [vmem:[%s5457_s12 + $0x70] sm:$0xff]  ;;  %v4152_v38 = vld [vmem:[%s5498_s19 + $0x278] sm:$0xff]  ;;  %1987 = vmatpush.bf16.msrb.mxu3 %v4135_v36 }
 0x56a   : > { %1711 = vmatpush.bf16.msra.mxu1 %v4119_v43 }
 0x56b   : > { %v1411_v10 = vmul.f32 %v4275_v37, %v1407_v39  ;;  %v4144_v37 = vld [vmem:[%s5498_s19 + $0x238] sm:$0xff]  ;;  %v4126_v39 = vld [vmem:[%s5498_s19 + $0x1a8] sm:$0xff] }
 0x56c   : > { %2047 = vmatpush.bf16.msrb.mxu0 %v4144_v37  ;;  %1927 = vmatpush.bf16.msrb.mxu2 %v4126_v39  ;;  %v4280_v39 = vld [vmem:[%s5501_s5 + $0x8] ss:$0 sm:$0xff] }
 0x56d   : > { %v4907_v41 = vadd.f32 %v4276_v40, %v1411_v10  ;;  %v4134_v40 = vld [vmem:[%s5498_s19 + $0x1e8] sm:$0xff]  ;;  %v4125_v10 = vld [vmem:[%s5498_s19 + $0x1a0] sm:$0xff] }
 0x56e   : > { %1712 = vmatpush.bf16.msra.mxu1 %v4118_v46  ;;  %1988 = vmatpush.bf16.msrb.mxu3 %v4134_v40  ;;  %v4124_v46 = vld [vmem:[%s5498_s19 + $0x198] sm:$0xff]  ;;  %v4281_v40 = vld [vmem:[%s5501_s5 + $0x9] ss:$0 sm:$0xff] }
 0x56f   : > { %v1433_v42 = vpack.c.bf16 %v4907_v41, %v4907_v41 }
 0x570   : > { %1928 = vmatpush.bf16.msrb.mxu2 %v4125_v10 }
 0x571   : > { %1527 = vmatmul.bf16.vlgmr.msra.gmra.mxu2 %v1433_v42  ;;  %1540 = vmatmul.bf16.vlgmr.msra.gmra.mxu3 %v1433_v42 }
 0x572   : > { %1713 = vmatpush.bf16.msra.mxu1 %v4117_v49  ;;  %v4143_v49 = vld [vmem:[%s5498_s19 + $0x230] sm:$0xff] }
 0x573   : > { %2048 = vmatpush.bf16.msrb.mxu0 %v4143_v49 }
 0x574   : > { %1929 = vmatpush.bf16.msrb.mxu2 %v4124_v46  ;;  %v4282_v46 = vld [vmem:[%s5501_s5 + $0x6] ss:$0 sm:$0xff] }
 0x576   : > { %1714 = vmatpush.bf16.msra.mxu1 %v4116_v51  ;;  %v4123_v51 = vld [vmem:[%s5498_s19 + $0x190] sm:$0xff] }
 0x578   : > { %1930 = vmatpush.bf16.msrb.mxu2 %v4123_v51 }
 0x57a   : > { %1715 = vmatpush.bf16.msra.mxu1 %v4115_v53  ;;  %v4142_v53 = vld [vmem:[%s5498_s19 + $0x228] sm:$0xff] }
 0x57b   : > { %2049 = vmatpush.bf16.msrb.mxu0 %v4142_v53 }
 0x57e   : > { %1716 = vmatpush.bf16.msra.mxu1 %v4114_v55  ;;  %v4122_v55 = vld [vmem:[%s5498_s19 + $0x188] sm:$0xff] }
 0x57f   : > { %1931 = vmatpush.bf16.msrb.mxu2 %v4122_v55 }
 0x582   : > { %1717 = vmatpush.bf16.msra.mxu1 %v4113_v57  ;;  %v4141_v57 = vld [vmem:[%s5498_s19 + $0x220] sm:$0xff] }
 0x583   : > { %2050 = vmatpush.bf16.msrb.mxu0 %v4141_v57 }
 0x586   : > { %2108 = vmatpush.bf16.msrb.mxu1 %v4152_v38 }
 0x58a   : > { %2109 = vmatpush.bf16.msrb.mxu1 %v4151_v50 }
 0x58e   : > { %2110 = vmatpush.bf16.msrb.mxu1 %v4150_v54 }
 0x592   : > { %2111 = vmatpush.bf16.msrb.mxu1 %v4149_v58 }
 0x5f4   : > { %v1528_v61 = vpop.f32.mrf.mxu2  ;;  %v1541_v62 = vpop.f32.mrf.mxu3 }
 0x5f5   : > { %v1529_v63 = vadd.f32 %v1528_v61, %v1435_v59  ;;  %v1542_v0 = vadd.f32 %v1541_v62, %v1436_v60  ;;  %v4121_v59 = vld [vmem:[%s5498_s19 + $0x180] sm:$0xff]  ;;  %v4140_v61 = vld [vmem:[%s5498_s19 + $0x218] sm:$0xff] }
 0x5f6   : > { %v4129_v60 = vld [vmem:[%s5498_s19 + $0x1c0] sm:$0xff]  ;;  %v4148_v62 = vld [vmem:[%s5498_s19 + $0x258] sm:$0xff]  ;;  %1932 = vmatpush.bf16.msrb.mxu2 %v4121_v59  ;;  %2051 = vmatpush.bf16.msrb.mxu0 %v4140_v61  ;;  %v4284_v61 = vld [vmem:[%s5501_s5 + $0xa] ss:$0 sm:$0xff] }
 0x5f7   : > { %v1545_v1 = vmul.f32 %v1529_v63, %v1529_v63  ;;  %v1546_v2 = vmul.f32 %v1542_v0, %v1542_v0  ;;  %2112 = vmatpush.bf16.msrb.mxu1 %v4148_v62  ;;  %v4285_v62 = vld [vmem:[%s5501_s5 + $0xb] ss:$0 sm:$0xff] }
 0x5f9   : > { %v1547_v3 = vmul.f32 %v1545_v1, %v1529_v63  ;;  %v1548_v4 = vmul.f32 %v1546_v2, %v1542_v0  ;;  %v4139_v1 = vld [vmem:[%s5498_s19 + $0x210] sm:$0xff] }
 0x5fa   : > { %v4147_v2 = vld [vmem:[%s5498_s19 + $0x250] sm:$0xff]  ;;  %2052 = vmatpush.bf16.msrb.mxu0 %v4139_v1 }
 0x5fb   : > { %v1549_v5 = vmul.f32 0.044715, %v1547_v3  ;;  %v1550_v6 = vmul.f32 0.044715, %v1548_v4  ;;  %v4159_v3 = vld [vmem:[%s5498_s19 + $0x2b0] sm:$0xff]  ;;  %2113 = vmatpush.bf16.msrb.mxu1 %v4147_v2 }
 0x5fc   : > { %v1530_v7 = vpop.f32.mrf.mxu2  ;;  %v1543_v8 = vpop.f32.mrf.mxu3  ;;  %v4167_v4 = vld [vmem:[%s5498_s19 + $0x2f0] sm:$0xff] }
 0x5fd   : > { %v1551_v9 = vadd.f32 %v1549_v5, %v1529_v63  ;;  %v1552_v11 = vadd.f32 %v1550_v6, %v1542_v0  ;;  %v4138_v5 = vld [vmem:[%s5498_s19 + $0x208] sm:$0xff] }
 0x5fe   : > { %v4146_v6 = vld [vmem:[%s5498_s19 + $0x248] sm:$0xff]  ;;  %2053 = vmatpush.bf16.msrb.mxu0 %v4138_v5 }
 0x5ff   : > { %v1553_v12 = vmul.f32 0.7978846, %v1551_v9  ;;  %v1554_v13 = vmul.f32 0.7978846, %v1552_v11  ;;  %v4158_v7 = vld [vmem:[%s5498_s19 + $0x2a8] sm:$0xff]  ;;  %2114 = vmatpush.bf16.msrb.mxu1 %v4146_v6  ;;  %v4137_v9 = vld [vmem:[%s5498_s19 + $0x200] sm:$0xff] }
 0x600   : > { %v4166_v8 = vld [vmem:[%s5498_s19 + $0x2e8] sm:$0xff]  ;;  %v4145_v11 = vld [vmem:[%s5498_s19 + $0x240] sm:$0xff] }
 0x601   : > { %4306 = vtanh.f32 %v1553_v12  ;;  %v4157_v12 = vld [vmem:[%s5498_s19 + $0x2a0] sm:$0xff] }
 0x602   : > { %4308 = vtanh.f32 %v1554_v13  ;;  %v4165_v13 = vld [vmem:[%s5498_s19 + $0x2e0] sm:$0xff]  ;;  %2054 = vmatpush.bf16.msrb.mxu0 %v4137_v9 }
 0x603   : > { %2115 = vmatpush.bf16.msrb.mxu1 %v4145_v11 }
 0x607   : > { %v4307_v14 = vpop.eup %4306 }
 0x608   : > { %v4309_v15 = vpop.eup %4308  ;;  %v1557_v16 = vadd.f32 1.0, %v4307_v14  ;;  %v4156_v14 = vld [vmem:[%s5498_s19 + $0x298] sm:$0xff] }
 0x609   : > { %v1558_v18 = vadd.f32 1.0, %v4309_v15  ;;  %v4164_v15 = vld [vmem:[%s5498_s19 + $0x2d8] sm:$0xff] }
 0x60a   : > { %v1559_v19 = vmul.f32 0.5, %v1557_v16 }
 0x60b   : > { %v1560_v20 = vmul.f32 0.5, %v1558_v18 }
 0x60c   : > { %v1561_v21 = vmul.f32 %v1559_v19, %v1529_v63  ;;  %v4160_v63 = vld [vmem:[%s5498_s19 + $0x2b8] sm:$0xff]  ;;  %v4155_v19 = vld [vmem:[%s5498_s19 + $0x290] sm:$0xff] }
 0x60d   : > { %v1562_v22 = vmul.f32 %v1560_v20, %v1542_v0  ;;  %v4168_v0 = vld [vmem:[%s5498_s19 + $0x2f8] sm:$0xff]  ;;  %2169 = vmatpush.bf16.msra.mxu2 %v4160_v63  ;;  %v4163_v20 = vld [vmem:[%s5498_s19 + $0x2d0] sm:$0xff] }
 0x60e   : > { %v1596_v23 = vpack.c.bf16 %v1561_v21, %v1561_v21 }
 0x60f   : > { %v1597_v24 = vpack.c.bf16 %v1562_v22, %v1562_v22  ;;  %v4154_v22 = vld [vmem:[%s5498_s19 + $0x288] sm:$0xff] }
 0x610   : > { %1705 = vmatmul.bf16.vlgmr.msra.gmra.mxu0 %v1596_v23  ;;  %v4162_v23 = vld [vmem:[%s5498_s19 + $0x2c8] sm:$0xff] }
 0x611   : > { %1718 = vmatmul.bf16.vlgmr.msra.gmra.mxu1 %v1597_v24  ;;  %2170 = vmatpush.bf16.msra.mxu2 %v4159_v3  ;;  %v4153_v24 = vld [vmem:[%s5498_s19 + $0x280] sm:$0xff] }
 0x615   : > { %2171 = vmatpush.bf16.msra.mxu2 %v4158_v7 }
 0x619   : > { %2172 = vmatpush.bf16.msra.mxu2 %v4157_v12 }
 0x61d   : > { %2173 = vmatpush.bf16.msra.mxu2 %v4156_v14 }
 0x621   : > { %2174 = vmatpush.bf16.msra.mxu2 %v4155_v19 }
 0x625   : > { %2175 = vmatpush.bf16.msra.mxu2 %v4154_v22 }
 0x629   : > { %2176 = vmatpush.bf16.msra.mxu2 %v4153_v24 }
 0x68d   : > { %v1706_v26 = vpop.f32.mrf.mxu0 }
 0x68e   : > { %v1707_v27 = vadd.f32 %v4277_v25, %v1706_v26  ;;  %v1719_v28 = vpop.f32.mrf.mxu1  ;;  %v4161_v25 = vld [vmem:[%s5498_s19 + $0x2c0] sm:$0xff] }
 0x690   : > { %v1720_v29 = vadd.f32 %v1719_v28, %v1707_v27 }
 0x692   : > { %v1723_v30 = vadd.f32 %v1720_v29, %v4907_v41  ;;  %v4133_v41 = vld [vmem:[%s5498_s19 + $0x1e0] sm:$0xff] }
 0x693   : > { %1989 = vmatpush.bf16.msrb.mxu3 %v4133_v41 }
 0x694   : > { %1726 = vadd.xlane.f32.xlu2 %v1723_v30 }
 0x695   : > { %v1708_v31 = vpop.f32.mrf.mxu0 }
 0x696   : > { %v1721_v32 = vpop.f32.mrf.mxu1 }
 0x697   : > { %1990 = vmatpush.bf16.msrb.mxu3 %v4132_v48  ;;  %v4278_v32 = vld [vmem:[%s5459_s14] ss:$0 sm:$0xff]  ;;  %v4283_v48 = vld [vmem:[%s5501_s5 + $0x7] ss:$0 sm:$0xff]  ;;  %s2997_s5 = scalar_lea.sflag [#allocation3], %s629_s28 }
 0x69b   : > { %1991 = vmatpush.bf16.msrb.mxu3 %v4131_v52 }
 0x69f   : > { %1992 = vmatpush.bf16.msrb.mxu3 %v4130_v56 }
 0x6a3   : > { %1993 = vmatpush.bf16.msrb.mxu3 %v4129_v60 }
 0x6a7   : > { %2230 = vmatpush.bf16.msra.mxu3 %v4168_v0 }
 0x6ab   : > { %2231 = vmatpush.bf16.msra.mxu3 %v4167_v4 }
 0x6af   : > { %2232 = vmatpush.bf16.msra.mxu3 %v4166_v8 }
 0x6b3   : > { %2233 = vmatpush.bf16.msra.mxu3 %v4165_v13 }
 0x6b7   : > { %2234 = vmatpush.bf16.msra.mxu3 %v4164_v15 }
 0x6bb   : > { %2235 = vmatpush.bf16.msra.mxu3 %v4163_v20 }
 0x6bf   : > { %2236 = vmatpush.bf16.msra.mxu3 %v4162_v23 }
 0x6c3   : > { %2237 = vmatpush.bf16.msra.mxu3 %v4161_v25 }
 0x707   : > { %v1727_v42 = vpop.xlane.xlu2 %1726 }
 0x708   : > { %v1728_v44 = vmul.f32 %v1727_v42, %v4590_v17 }
 0x70a   : > { %v4991_v43 = vsub.f32 %v1723_v30, %v1728_v44 }
 0x70c   : > { %v1730_v45 = vmul.f32 %v4991_v43, %v4991_v43 }
 0x70e   : > { %1731 = vadd.xlane.f32.xlu0 %v1730_v45 }
 0x781   : > { %v1732_v16 = vpop.xlane.xlu0 %1731 }
 0x782   : > { %v1733_v18 = vmul.f32 %v1732_v16, %v4590_v17 }
 0x784   : > { %v1734_v21 = vadd.f32 1e-12, %v1733_v18 }
 0x786   : > { %4310 = vrsqrt.f32 %v1734_v21  ;;  %vm1741_vm11 = vweird.f32 %v1734_v21 }
 0x78c   : > { %v4311_v26 = vpop.eup %4310 }
 0x78d   : > { %v1736_v27 = vmul.f32 %v4311_v26, %v1734_v21  ;;  %vm1742_vm10 = vweird.f32 %v4311_v26 }
 0x78e   : > { %vm1743_vm12 = vmor %vm1741_vm11, %vm1742_vm10 }
 0x78f   : > { %v1737_v28 = vmul.f32 %v4311_v26, %v1736_v27 }
 0x791   : > { %v1738_v29 = vmul.f32 0.5, %v1737_v28 }
 0x793   : > { %v1739_v30 = vsub.f32 1.5, %v1738_v29 }
 0x795   : > { %v1740_v31 = vmul.f32 %v4311_v26, %v1739_v30  ;;  %v4172_v30 = vld [vmem:[%s5502_s6 + $0x58] sm:$0xff] }
 0x797   : > { %v1744_v33 = vsel %vm1743_vm12, %v4311_v26, %v1740_v31  ;;  %v4176_v31 = vld [vmem:[%s5502_s6 + $0x78] sm:$0xff] }
 0x798   : > { %v1745_v35 = vmul.f32 %v1744_v33, %v4991_v43  ;;  %v4175_v33 = vld [vmem:[%s5502_s6 + $0x70] sm:$0xff] }
 0x79a   : > { %v1749_v36 = vmul.f32 %v4278_v32, %v1745_v35  ;;  %v4171_v32 = vld [vmem:[%s5502_s6 + $0x50] sm:$0xff]  ;;  %v4174_v35 = vld [vmem:[%s5502_s6 + $0x68] sm:$0xff] }
 0x79c   : > { %v5117_v37 = vadd.f32 %v4279_v34, %v1749_v36  ;;  %v4170_v34 = vld [vmem:[%s5502_s6 + $0x48] sm:$0xff] }
 0x79e   : > { %v1754_v38 = vpack.c.bf16 %v5117_v37, %v5117_v37 }
 0x7a0   : > { %1933 = vmatmul.bf16.vlgmr.msrb.gmra.mxu2 %v1754_v38  ;;  %1994 = vmatmul.bf16.vlgmr.msrb.gmra.mxu3 %v1754_v38 }
 0x7a1   : > { %2055 = vmatmul.bf16.vlgmr.msrb.gmra.mxu0 %v1754_v38  ;;  %2116 = vmatmul.bf16.vlgmr.msrb.gmra.mxu1 %v1754_v38 }
 0x7a2   : > { %2403 = vmatpush.bf16.msrb.mxu2 %v4172_v30  ;;  %2443 = vmatpush.bf16.msrb.mxu3 %v4176_v31  ;;  %v3822_v31 = vld [vmem:[%s5455_s10 + $0xa0] sm:$0xf] }
 0x7a6   : > { %2404 = vmatpush.bf16.msrb.mxu2 %v4171_v32  ;;  %2444 = vmatpush.bf16.msrb.mxu3 %v4175_v33  ;;  %v4182_v32 = vld [vmem:[%s5455_s10 + $0xa4] sm:$0xf0]  ;;  %v4181_v33 = vld [vmem:[%s5455_s10 + $0xa4] sm:$0xf] }
 0x7aa   : > { %2405 = vmatpush.bf16.msrb.mxu2 %v4170_v34  ;;  %2445 = vmatpush.bf16.msrb.mxu3 %v4174_v35  ;;  %v3823_v34 = vor.u32 %v4182_v32, %v3822_v31  ;;  %v3824_v35 = vld [vmem:[%s5455_s10 + $0xa8] sm:$0xf0] }
 0x7b0   : > { %2177 = vmatmul.bf16.vlgmr.msra.gmra.mxu2 %v1754_v38  ;;  %2238 = vmatmul.bf16.vlgmr.msra.gmra.mxu3 %v1754_v38 }
 0x81e   : > { %v2056_v10 = vpop.f32.mrf.mxu0  ;;  %v2117_v41 = vpop.f32.mrf.mxu1 }
 0x81f   : > { %v2057_v42 = vadd.f32 %v4280_v39, %v2056_v10  ;;  %v2118_v44 = vadd.f32 %v4281_v40, %v2117_v41 }
 0x821   : > { %v2245_v43 = vpack.c.bf16 %v2057_v42, %v2057_v42  ;;  %v2246_v45 = vpack.c.bf16 %v2118_v44, %v2118_v44 }
 0x823   : > { %v2251_v49 = vsel %vm1169_vm4, %v2245_v43, 0  ;;  %v2270_v50 = vsel %vm1169_vm4, %v2246_v45, 0  ;;  %v1934_v51 = vpop.f32.mrf.mxu2  ;;  %v1995_v52 = vpop.f32.mrf.mxu3  ;;  %v4169_v43 = vld [vmem:[%s5502_s6 + $0x40] sm:$0xff] }
 0x824   : > { %2260 = vmatpush.bf16.xpose.msra.mxu0 %v2251_v49  ;;  %2279 = vmatpush.bf16.xpose.msra.mxu1 %v2270_v50  ;;  %v1935_v53 = vadd.f32 %v4282_v46, %v1934_v51  ;;  %v1996_v54 = vadd.f32 %v4283_v48, %v1995_v52  ;;  %v4173_v45 = vld [vmem:[%s5502_s6 + $0x60] sm:$0xff]  ;;  %s4344_s6 = sshra.s32 %s3010_s3, 4  ;;  %s4345_s6 = int_to_ptr.hbm [resolvable:$true] %s4344_s6 }
 0x825   : > { %2406 = vmatpush.bf16.msrb.mxu2 %v4169_v43  ;;  %2446 = vmatpush.bf16.msrb.mxu3 %v4173_v45  ;;  %v4178_v43 = vld [vmem:[%s5455_s10 + $0x84] sm:$0xf0]  ;;  %v4177_v45 = vld [vmem:[%s5455_s10 + $0x84] sm:$0xf]  ;;  %p4351_p0 = scmp.lt.s32.totalorder %s4345_s6, %s5505_s20 }
 0x826   : > { %v2058_v55 = vpop.f32.mrf.mxu0  ;;  %v2119_v56 = vpop.f32.mrf.mxu1  ;;  %v2243_v57 = vpack.c.bf16 %v1935_v53, %v1935_v53  ;;  %v2244_v58 = vpack.c.bf16 %v1996_v54, %v1996_v54  ;;  %v4286_v54 = vld [vmem:[%s5503_s7 + $0x1] ss:$0 sm:$0xff]  ;;  %s4346_s7 = scalar_lea.hbm %s4345_s6, 1 }
 0x827   : > { %p4347_p11 = scmp.ne.s32.totalorder %s4345_s6, %s4346_s7  ;;  %p4352_p1 = scmp.lt.s32.totalorder %s4350_s1, %s4346_s7 }
 0x829   : > { %p4348_p12 = pnand %p4347_p11, %p4538_p5  ;;  %p4353_p2 = por %p4352_p1, %p4351_p0 }
 0x82b   : > { %3730 = vmatmul.msk.bf16.vlgmr.msra.gmra.mxu0 %vm1169_vm4, %v2243_v57  ;;  %3731 = vmatmul.msk.bf16.vlgmr.msra.gmra.mxu1 %vm1169_vm4, %v2244_v58  ;;  %v1936_v59 = vpop.f32.mrf.mxu2  ;;  %v1997_v60 = vpop.f32.mrf.mxu3  ;;  %p4349_p13 = pneg %p4348_p12 }
 0x82d   : > { %p4354_p3 = pnand %p4353_p2, %p4349_p13 }
 0x833   : > { %v2178_v63 = vpop.f32.mrf.mxu2  ;;  %v2239_v0 = vpop.f32.mrf.mxu3 }
 0x834   : > { %v2179_v1 = vadd.f32 %v4284_v61, %v2178_v63  ;;  %v2240_v2 = vadd.f32 %v4285_v62, %v2239_v0  ;;  %v3862_v61 = vld [vmem:[%s5455_s10 + $0xf0] sm:$0xf]  ;;  %v4192_v62 = vld [vmem:[%s5455_s10 + $0xf4] sm:$0xf0]  ;;  %v4191_v63 = vld [vmem:[%s5455_s10 + $0xf4] sm:$0xf] }
 0x835   : > { %v3863_v0 = vor.u32 %v4192_v62, %v3862_v61  ;;  %v4287_v61 = vld [vmem:[%s5453_s8 + $0x1] ss:$0 sm:$0xff] }
 0x836   : > { %v2313_v3 = vpack.c.bf16 %v2179_v1, %v2179_v1  ;;  %v2314_v4 = vpack.c.bf16 %v2240_v2, %v2240_v2 }
 0x838   : > { %v2319_v5 = vsel %vm1245_vm5, %v2313_v3, 0  ;;  %v2338_v6 = vsel %vm1245_vm5, %v2314_v4, 0 }
 0x839   : > { %2328 = vmatpush.bf16.msrb.mxu0 %v2319_v5  ;;  %2347 = vmatpush.bf16.msrb.mxu1 %v2338_v6  ;;  %v3854_v6 = vld [vmem:[%s5455_s10 + $0xe0] sm:$0xf] }
 0x83b   : > { %v2180_v7 = vpop.f32.mrf.mxu2  ;;  %v2241_v8 = vpop.f32.mrf.mxu3 }
 0x83c   : > { %v4190_v7 = vld [vmem:[%s5455_s10 + $0xe4] sm:$0xf0]  ;;  %v4189_v8 = vld [vmem:[%s5455_s10 + $0xe4] sm:$0xf] }
 0x83d   : > { %2597 = vmatpush.bf16.msra.mxu0 %v3863_v0  ;;  %v4288_v0 = vld [vmem:[%s5454_s9 + $0x1] ss:$0 sm:$0xff] }
 0x8a8   : > { %v2262_v9 = vpop.f32.mrf.mxu0  ;;  %v2281_v11 = vpop.f32.mrf.mxu1 }
 0x8a9   : > { %v2285_v12 = vmul.f32 0.125, %v2262_v9  ;;  %v2286_v13 = vmul.f32 0.125, %v2281_v11  ;;  %v3855_v9 = vor.u32 %v4190_v7, %v3854_v6  ;;  %v3856_v11 = vld [vmem:[%s5455_s10 + $0xe8] sm:$0xf0]  ;;  %v4197_v7 = vld [vmem:[%s5457_s12 + $0xa0] sm:$0xff] }
 0x8aa   : > { %v4206_v6 = vld [vmem:[%s5457_s12 + $0xe8] sm:$0xff] }
 0x8ab   : > { %v2288_v14 = vadd.f32 %v4752_v47, %v2286_v13  ;;  %v2287_v15 = vadd.f32 %v4752_v47, %v2285_v12  ;;  %v3859_v12 = vor.u32 %v4189_v8, %v3856_v11  ;;  %2598 = vmatpush.bf16.msra.mxu0 %v3855_v9  ;;  %v3846_v13 = vld [vmem:[%s5455_s10 + $0xd0] sm:$0xf]  ;;  %v4205_v8 = vld [vmem:[%s5457_s12 + $0xe0] sm:$0xff]  ;;  %v4196_v9 = vld [vmem:[%s5457_s12 + $0x98] sm:$0xff] }
 0x8ac   : > { %v4204_v11 = vld [vmem:[%s5457_s12 + $0xd8] sm:$0xff] }
 0x8ad   : > { %v2292_v16 = vsel %vm1215_vm6, %v2288_v14, -inf  ;;  %v2289_v18 = vsel %vm1215_vm6, %v2287_v15, -inf }
 0x8ae   : > { %2293 = vmax.xlane.f32.xlu2 %v2292_v16  ;;  %2290 = vmax.xlane.f32.xlu1 %v2289_v18  ;;  %v3848_v18 = vld [vmem:[%s5455_s10 + $0xd8] sm:$0xf0] }
 0x8b0   : > { %v2264_v19 = vpop.f32.mrf.mxu0  ;;  %v2283_v20 = vpop.f32.mrf.mxu1 }
 0x8b1   : > { %v3838_v20 = vld [vmem:[%s5455_s10 + $0xc0] sm:$0xf] }
 0x921   : > { %v2294_v21 = vpop.xlane.xlu2 %2293  ;;  %v2291_v22 = vpop.xlane.xlu1 %2290 }
 0x922   : > { %v2296_v23 = vsub.f32 %v2288_v14, %v2294_v21  ;;  %v2295_v24 = vsub.f32 %v2287_v15, %v2291_v22  ;;  %v4188_v14 = vld [vmem:[%s5455_s10 + $0xd4] sm:$0xf0]  ;;  %v4187_v15 = vld [vmem:[%s5455_s10 + $0xd4] sm:$0xf]  ;;  %v4186_v21 = vld [vmem:[%s5455_s10 + $0xc4] sm:$0xf0] }
 0x923   : > { %v3847_v16 = vor.u32 %v4188_v14, %v3846_v13  ;;  %v3851_v19 = vor.u32 %v4187_v15, %v3848_v18  ;;  %v4185_v22 = vld [vmem:[%s5455_s10 + $0xc4] sm:$0xf]  ;;  %v4203_v13 = vld [vmem:[%s5457_s12 + $0xd0] sm:$0xff]  ;;  %v4194_v14 = vld [vmem:[%s5457_s12 + $0x88] sm:$0xff] }
 0x924   : > { %v2299_v25 = vmul.f32 1.442695, %v2296_v23  ;;  %v2297_v26 = vmul.f32 1.442695, %v2295_v24  ;;  %v3839_v23 = vor.u32 %v4186_v21, %v3838_v20  ;;  %v3840_v24 = vld [vmem:[%s5455_s10 + $0xc8] sm:$0xf0] }
 0x925   : > { %2599 = vmatpush.bf16.msra.mxu0 %v3847_v16  ;;  %v4202_v15 = vld [vmem:[%s5457_s12 + $0xc8] sm:$0xff]  ;;  %v4193_v16 = vld [vmem:[%s5457_s12 + $0x80] sm:$0xff] }
 0x926   : > { %4312 = vpow2.f32 %v2299_v25  ;;  %v3843_v25 = vor.u32 %v4185_v22, %v3840_v24  ;;  %v4201_v18 = vld [vmem:[%s5457_s12 + $0xc0] sm:$0xff] }
 0x927   : > { %4314 = vpow2.f32 %v2297_v26  ;;  %v3830_v26 = vld [vmem:[%s5455_s10 + $0xb0] sm:$0xf] }
 0x929   : > { %2600 = vmatpush.bf16.msra.mxu0 %v3839_v23 }
 0x92c   : > { %v4313_v27 = vpop.eup %4312 }
 0x92d   : > { %v4315_v28 = vpop.eup %4314  ;;  %v2304_v47 = vsel %vm1215_vm6, %v4313_v27, 0.0 }
 0x92e   : > { %2305 = vadd.xlane.f32.xlu1 %v2304_v47  ;;  %v2301_v29 = vsel %vm1215_vm6, %v4315_v28, 0.0 }
 0x92f   : > { %2302 = vadd.xlane.f32.xlu0 %v2301_v29  ;;  %v3832_v29 = vld [vmem:[%s5455_s10 + $0xb8] sm:$0xf0] }
 0x9a1   : > { %v2306_v36 = vpop.xlane.xlu1 %2305 }
 0x9a2   : > { %v2303_v38 = vpop.xlane.xlu0 %2302  ;;  %4316 = vrcp.f32 %v2306_v36  ;;  %v3827_v36 = vor.u32 %v4181_v33, %v3824_v35 }
 0x9a3   : > { %4318 = vrcp.f32 %v2303_v38  ;;  %v3814_v38 = vld [vmem:[%s5455_s10 + $0x90] sm:$0xf] }
 0x9a8   : > { %v4317_v39 = vpop.eup %4316 }
 0x9a9   : > { %v4319_v40 = vpop.eup %4318  ;;  %v2310_v10 = vmul.f32 %v4317_v39, %v4313_v27  ;;  %v4184_v27 = vld [vmem:[%s5455_s10 + $0xb4] sm:$0xf0] }
 0x9aa   : > { %v2309_v41 = vmul.f32 %v4319_v40, %v4315_v28  ;;  %v4183_v28 = vld [vmem:[%s5455_s10 + $0xb4] sm:$0xf]  ;;  %v3831_v47 = vor.u32 %v4184_v27, %v3830_v26  ;;  %v4180_v39 = vld [vmem:[%s5455_s10 + $0x94] sm:$0xf0] }
 0x9ab   : > { %v2312_v42 = vpack.c.bf16 %v2310_v10, %v2310_v10  ;;  %v3835_v30 = vor.u32 %v4183_v28, %v3832_v29  ;;  %v4179_v40 = vld [vmem:[%s5455_s10 + $0x94] sm:$0xf]  ;;  %v3815_v10 = vor.u32 %v4180_v39, %v3814_v38 }
 0x9ac   : > { %v2311_v44 = vpack.c.bf16 %v2309_v41, %v2309_v41  ;;  %2601 = vmatpush.bf16.msra.mxu0 %v3831_v47  ;;  %v3816_v41 = vld [vmem:[%s5455_s10 + $0x98] sm:$0xf0] }
 0x9ad   : > { %3733 = vmatmul.msk.bf16.vlgmr.msrb.gmra.mxu1 %vm1215_vm6, %v2312_v42  ;;  %v3819_v42 = vor.u32 %v4179_v40, %v3816_v41 }
 0x9ae   : > { %3732 = vmatmul.msk.bf16.vlgmr.msrb.gmra.mxu0 %vm1215_vm6, %v2311_v44  ;;  %v3806_v44 = vld [vmem:[%s5455_s10 + $0x80] sm:$0xf] }
 0x9b0   : > { %2602 = vmatpush.bf16.msra.mxu0 %v3823_v34 }
 0x9b4   : > { %2603 = vmatpush.bf16.msra.mxu0 %v3815_v10 }
 0xa2a   : > { %v2349_v46 = vpop.f32.mrf.mxu1 }
 0xa2b   : > { %v2330_v48 = vpop.f32.mrf.mxu0  ;;  %v2354_v49 = vpack.c.bf16 %v2349_v46, %v2349_v46  ;;  %v3807_v46 = vor.u32 %v4178_v43, %v3806_v44 }
 0xa2c   : > { %v2353_v50 = vpack.c.bf16 %v2330_v48, %v2330_v48  ;;  %v3808_v48 = vld [vmem:[%s5455_s10 + $0x88] sm:$0xf0] }
 0xa2d   : > { %3783 = vmatmul.msk.bf16.vlgmr.msrb.gmra.mxu3 %vm1169_vm4, %v2354_v49  ;;  %v3811_v49 = vor.u32 %v4177_v45, %v3808_v48  ;;  %2604 = vmatpush.bf16.msra.mxu0 %v3807_v46  ;;  %v4289_v48 = vld [vmem:[%s5458_s13 + $0x1] ss:$0 sm:$0xff] }
 0xa2e   : > { %3766 = vmatmul.msk.bf16.vlgmr.msrb.gmra.mxu2 %vm1169_vm4, %v2353_v50  ;;  %v4200_v50 = vld [vmem:[%s5457_s12 + $0xb8] sm:$0xff] }
 0xa2f   : > { %2777 = vmatpush.bf16.msra.mxu2 %v4200_v50 }
 0xa32   : > { %v2351_v51 = vpop.f32.mrf.mxu1 }
 0xa33   : > { %v2332_v52 = vpop.f32.mrf.mxu0  ;;  %v4208_v51 = vld [vmem:[%s5457_s12 + $0xf8] sm:$0xff] }
 0xa34   : > { %2790 = vmatpush.bf16.msra.mxu3 %v4208_v51 }
 0xab0   : > { %v2448_v53 = vpop.f32.mrf.mxu3 }
 0xab1   : > { %v2408_v55 = vpop.f32.mrf.mxu2 }
 0xab2   : > { %v2452_v56 = vadd.f32 %v2448_v53, %v2408_v55 }
 0xab4   : > { %v2458_v57 = vadd.f32 %v4286_v54, %v2452_v56 }
 0xab6   : > { %v2459_v58 = vadd.f32 %v2458_v57, %v5117_v37  ;;  %v3864_v37 = vld [vmem:[%s5455_s10 + $0xf8] sm:$0xf0] }
 0xab7   : > { %v3867_v1 = vor.u32 %v4191_v63, %v3864_v37 }
 0xab8   : > { %2464 = vadd.xlane.f32.xlu2 %v2459_v58  ;;  %v2450_v59 = vpop.f32.mrf.mxu3 }
 0xab9   : > { %v2410_v60 = vpop.f32.mrf.mxu2  ;;  %2610 = vmatpush.bf16.msra.mxu1 %v3867_v1 }
 0xabd   : > { %2611 = vmatpush.bf16.msra.mxu1 %v3859_v12  ;;  %v4195_v12 = vld [vmem:[%s5457_s12 + $0x90] sm:$0xff] }
 0xac1   : > { %2612 = vmatpush.bf16.msra.mxu1 %v3851_v19  ;;  %v3803_v19 = vld [vmem:[%s5456_s11 + $0x2] sm:$0x3] }
 0xac2   : > { %v2513_v20 = vperm.slane %v3803_v19, 0  ;;  %v2514_v21 = vperm.slane %v3803_v19, 1 }
 0xac5   : > { %2613 = vmatpush.bf16.msra.mxu1 %v3843_v25 }
 0xac9   : > { %2614 = vmatpush.bf16.msra.mxu1 %v3835_v30 }
 0xacd   : > { %2615 = vmatpush.bf16.msra.mxu1 %v3827_v36 }
 0xad1   : > { %2616 = vmatpush.bf16.msra.mxu1 %v3819_v42 }
 0xad5   : > { %2617 = vmatpush.bf16.msra.mxu1 %v3811_v49 }
 0xb2b   : > { %v2465_v2 = vpop.xlane.xlu2 %2464 }
 0xb2c   : > { %v2466_v3 = vmul.f32 %v2465_v2, %v4590_v17 }
 0xb2e   : > { %v5196_v4 = vsub.f32 %v2459_v58, %v2466_v3  ;;  %v4199_v3 = vld [vmem:[%s5457_s12 + $0xb0] sm:$0xff] }
 0xb2f   : > { %2778 = vmatpush.bf16.msra.mxu2 %v4199_v3  ;;  %v4224_v3 = vld [vmem:[%s5463_s18 + $0x38] sm:$0xff] }
 0xb30   : > { %v2468_v5 = vmul.f32 %v5196_v4, %v5196_v4  ;;  %2982 = vmatpush.bf16.msrb.mxu1 %v4224_v3 }
 0xb32   : > { %2469 = vadd.xlane.f32.xlu0 %v2468_v5  ;;  %v4198_v5 = vld [vmem:[%s5457_s12 + $0xa8] sm:$0xff] }
 0xb33   : > { %2779 = vmatpush.bf16.msra.mxu2 %v4198_v5 }
 0xb37   : > { %2780 = vmatpush.bf16.msra.mxu2 %v4197_v7 }
 0xb3b   : > { %2781 = vmatpush.bf16.msra.mxu2 %v4196_v9  ;;  %v4221_v9 = vld [vmem:[%s5463_s18 + $0x20] sm:$0xff] }
 0xb3f   : > { %2782 = vmatpush.bf16.msra.mxu2 %v4195_v12 }
 0xb43   : > { %2783 = vmatpush.bf16.msra.mxu2 %v4194_v14 }
 0xb47   : > { %2784 = vmatpush.bf16.msra.mxu2 %v4193_v16 }
 0xba5   : > { %v2470_v52 = vpop.xlane.xlu0 %2469 }
 0xba6   : > { %v2471_v53 = vmul.f32 %v2470_v52, %v4590_v17 }
 0xba8   : > { %v2472_v54 = vadd.f32 1e-12, %v2471_v53 }
 0xbaa   : > { %4320 = vrsqrt.f32 %v2472_v54  ;;  %vm2479_vm14 = vweird.f32 %v2472_v54 }
 0xbb0   : > { %v4321_v55 = vpop.eup %4320 }
 0xbb1   : > { %v2474_v56 = vmul.f32 %v4321_v55, %v2472_v54  ;;  %vm2480_vm13 = vweird.f32 %v4321_v55 }
 0xbb2   : > { %vm2481_vm15 = vmor %vm2479_vm14, %vm2480_vm13 }
 0xbb3   : > { %v2475_v57 = vmul.f32 %v4321_v55, %v2474_v56  ;;  %v4216_v56 = vld [vmem:[%s5461_s16 + $0x38] sm:$0xff] }
 0xbb4   : > { %2902 = vmatpush.bf16.msrb.mxu0 %v4216_v56 }
 0xbb5   : > { %v2476_v58 = vmul.f32 0.5, %v2475_v57 }
 0xbb7   : > { %v2477_v59 = vsub.f32 1.5, %v2476_v58 }
 0xbb9   : > { %v2478_v60 = vmul.f32 %v4321_v55, %v2477_v59 }
 0xbbb   : > { %v2482_v62 = vsel %vm2481_vm15, %v4321_v55, %v2478_v60 }
 0xbbc   : > { %v2483_v63 = vmul.f32 %v2482_v62, %v5196_v4  ;;  %v4207_v4 = vld [vmem:[%s5457_s12 + $0xf0] sm:$0xff]  ;;  %v4214_v62 = vld [vmem:[%s5461_s16 + $0x28] sm:$0xff] }
 0xbbd   : > { %2791 = vmatpush.bf16.msra.mxu3 %v4207_v4 }
 0xbbe   : > { %v2487_v37 = vmul.f32 %v4287_v61, %v2483_v63  ;;  %v4215_v61 = vld [vmem:[%s5461_s16 + $0x30] sm:$0xff]  ;;  %v4213_v63 = vld [vmem:[%s5461_s16 + $0x20] sm:$0xff] }
 0xbbf   : > { %2903 = vmatpush.bf16.msrb.mxu0 %v4215_v61 }
 0xbc0   : > { %v5298_v1 = vadd.f32 %v4288_v0, %v2487_v37  ;;  %v4212_v0 = vld [vmem:[%s5461_s16 + $0x18] sm:$0xff]  ;;  %v4211_v37 = vld [vmem:[%s5461_s16 + $0x10] sm:$0xff] }
 0xbc1   : > { %2792 = vmatpush.bf16.msra.mxu3 %v4206_v6  ;;  %v4223_v6 = vld [vmem:[%s5463_s18 + $0x30] sm:$0xff] }
 0xbc2   : > { %v2511_v2 = vpack.c.bf16 %v5298_v1, %v5298_v1  ;;  %2983 = vmatpush.bf16.msrb.mxu1 %v4223_v6 }
 0xbc3   : > { %2904 = vmatpush.bf16.msrb.mxu0 %v4214_v62 }
 0xbc4   : > { %2605 = vmatmul.bf16.vlgmr.msra.gmra.mxu0 %v2511_v2  ;;  %2618 = vmatmul.bf16.vlgmr.msra.gmra.mxu1 %v2511_v2  ;;  %v4209_v2 = vld [vmem:[%s5461_s16] sm:$0xff] }
 0xbc5   : > { %2793 = vmatpush.bf16.msra.mxu3 %v4205_v8  ;;  %v4222_v8 = vld [vmem:[%s5463_s18 + $0x28] sm:$0xff] }
 0xbc6   : > { %2984 = vmatpush.bf16.msrb.mxu1 %v4222_v8 }
 0xbc7   : > { %2905 = vmatpush.bf16.msrb.mxu0 %v4213_v63 }
 0xbc9   : > { %2794 = vmatpush.bf16.msra.mxu3 %v4204_v11 }
 0xbca   : > { %2985 = vmatpush.bf16.msrb.mxu1 %v4221_v9 }
 0xbcb   : > { %2906 = vmatpush.bf16.msrb.mxu0 %v4212_v0 }
 0xbcd   : > { %2795 = vmatpush.bf16.msra.mxu3 %v4203_v13 }
 0xbcf   : > { %2907 = vmatpush.bf16.msrb.mxu0 %v4211_v37 }
 0xbd1   : > { %2796 = vmatpush.bf16.msra.mxu3 %v4202_v15 }
 0xbd5   : > { %2797 = vmatpush.bf16.msra.mxu3 %v4201_v18  ;;  %v4290_v18 = vld [vmem:[%s5459_s14 + $0x1] ss:$0 sm:$0xff] }
 0xc41   : > { %v2606_v22 = vpop.f32.mrf.mxu0  ;;  %v2619_v23 = vpop.f32.mrf.mxu1 }
 0xc42   : > { %v2607_v24 = vadd.f32 %v2606_v22, %v2513_v20  ;;  %v2620_v25 = vadd.f32 %v2619_v23, %v2514_v21  ;;  %v4291_v21 = vld [vmem:[%s5460_s15 + $0x1] ss:$0 sm:$0xff] }
 0xc44   : > { %v2623_v26 = vmul.f32 %v2607_v24, %v2607_v24  ;;  %v2624_v27 = vmul.f32 %v2620_v25, %v2620_v25 }
 0xc46   : > { %v2625_v28 = vmul.f32 %v2623_v26, %v2607_v24  ;;  %v2626_v47 = vmul.f32 %v2624_v27, %v2620_v25  ;;  %v4218_v26 = vld [vmem:[%s5463_s18 + $0x8] sm:$0xff]  ;;  %v4217_v27 = vld [vmem:[%s5463_s18] sm:$0xff] }
 0xc48   : > { %v2627_v29 = vmul.f32 0.044715, %v2625_v28  ;;  %v2628_v30 = vmul.f32 0.044715, %v2626_v47  ;;  %v2852_v28 = vld [vmem:[%s5462_s17] sm:$0x1] }
 0xc49   : > { %v2608_v31 = vpop.f32.mrf.mxu0  ;;  %v2621_v32 = vpop.f32.mrf.mxu1 }
 0xc4a   : > { %v2629_v33 = vadd.f32 %v2627_v29, %v2607_v24  ;;  %v2630_v34 = vadd.f32 %v2628_v30, %v2620_v25 }
 0xc4c   : > { %v2631_v35 = vmul.f32 0.7978846, %v2629_v33  ;;  %v2632_v36 = vmul.f32 0.7978846, %v2630_v34  ;;  %v2932_v33 = vld [vmem:[%s5507_s30] sm:$0x1] }
 0xc4e   : > { %4322 = vtanh.f32 %v2631_v35 }
 0xc4f   : > { %4324 = vtanh.f32 %v2632_v36 }
 0xc54   : > { %v4323_v38 = vpop.eup %4322 }
 0xc55   : > { %v4325_v39 = vpop.eup %4324  ;;  %v2635_v40 = vadd.f32 1.0, %v4323_v38 }
 0xc56   : > { %v2636_v10 = vadd.f32 1.0, %v4325_v39 }
 0xc57   : > { %v2637_v41 = vmul.f32 0.5, %v2635_v40 }
 0xc58   : > { %v2638_v42 = vmul.f32 0.5, %v2636_v10 }
 0xc59   : > { %v2639_v44 = vmul.f32 %v2637_v41, %v2607_v24 }
 0xc5a   : > { %v2640_v43 = vmul.f32 %v2638_v42, %v2620_v25  ;;  %v4219_v25 = vld [vmem:[%s5463_s18 + $0x10] sm:$0xff] }
 0xc5b   : > { %v2676_v45 = vpack.c.bf16 %v2639_v44, %v2639_v44 }
 0xc5c   : > { %v2677_v46 = vpack.c.bf16 %v2640_v43, %v2640_v43 }
 0xc5d   : > { %2785 = vmatmul.bf16.vlgmr.msra.gmra.mxu2 %v2676_v45 }
 0xc5e   : > { %2798 = vmatmul.bf16.vlgmr.msra.gmra.mxu3 %v2677_v46 }
 0xce0   : > { %v2786_v49 = vpop.f32.mrf.mxu2 }
 0xce1   : > { %v2787_v50 = vadd.f32 %v4289_v48, %v2786_v49  ;;  %v2799_v51 = vpop.f32.mrf.mxu3 }
 0xce3   : > { %v2800_v52 = vadd.f32 %v2799_v51, %v2787_v50 }
 0xce5   : > { %v2803_v53 = vadd.f32 %v2800_v52, %v5298_v1  ;;  %v4210_v1 = vld [vmem:[%s5461_s16 + $0x8] sm:$0xff] }
 0xce6   : > { %2908 = vmatpush.bf16.msrb.mxu0 %v4210_v1 }
 0xce7   : > { %2808 = vadd.xlane.f32.xlu1 %v2803_v53 }
 0xce8   : > { %v2788_v54 = vpop.f32.mrf.mxu2 }
 0xce9   : > { %v2801_v55 = vpop.f32.mrf.mxu3 }
 0xcea   : > { %2909 = vmatpush.bf16.msrb.mxu0 %v4209_v2 }
 0xd5a   : > { %v2809_v57 = vpop.xlane.xlu1 %2808 }
 0xd5b   : > { %v2810_v58 = vmul.f32 %v2809_v57, %v4590_v17 }
 0xd5d   : > { %v2811_v59 = vsub.f32 %v2803_v53, %v2810_v58 }
 0xd5f   : > { %v2812_v60 = vmul.f32 %v2811_v59, %v2811_v59 }
 0xd61   : > { %2813 = vadd.xlane.f32.xlu2 %v2812_v60 }
 0xdd4   : > { %v2814_v4 = vpop.xlane.xlu2 %2813 }
 0xdd5   : > { %v2815_v5 = vmul.f32 %v2814_v4, %v4590_v17  ;;  %v4220_v17 = vld [vmem:[%s5463_s18 + $0x18] sm:$0xff] }
 0xdd6   : > { %2986 = vmatpush.bf16.msrb.mxu1 %v4220_v17 }
 0xdd7   : > { %v2816_v7 = vadd.f32 1e-12, %v2815_v5 }
 0xdd9   : > { %4326 = vrsqrt.f32 %v2816_v7  ;;  %vm2823_vm1 = vweird.f32 %v2816_v7 }
 0xdda   : > { %2987 = vmatpush.bf16.msrb.mxu1 %v4219_v25 }
 0xdde   : > { %2988 = vmatpush.bf16.msrb.mxu1 %v4218_v26 }
 0xddf   : > { %v4327_v11 = vpop.eup %4326 }
 0xde0   : > { %v2818_v12 = vmul.f32 %v4327_v11, %v2816_v7  ;;  %vm2824_vm0 = vweird.f32 %v4327_v11 }
 0xde1   : > { %vm2825_vm2 = vmor %vm2823_vm1, %vm2824_vm0 }
 0xde2   : > { %v2819_v13 = vmul.f32 %v4327_v11, %v2818_v12  ;;  %2989 = vmatpush.bf16.msrb.mxu1 %v4217_v27 }
 0xde4   : > { %v2820_v14 = vmul.f32 0.5, %v2819_v13 }
 0xde6   : > { %v2821_v15 = vsub.f32 1.5, %v2820_v14 }
 0xde8   : > { %v2822_v16 = vmul.f32 %v4327_v11, %v2821_v15 }
 0xdea   : > { %v2826_v19 = vsel %vm2825_vm2, %v4327_v11, %v2822_v16 }
 0xdeb   : > { %v2827_v20 = vmul.f32 %v2826_v19, %v2811_v59 }
 0xded   : > { %v2831_v22 = vmul.f32 %v4290_v18, %v2827_v20 }
 0xdef   : > { %v2835_v23 = vadd.f32 %v4291_v21, %v2831_v22 }
 0xdf1   : > { %v2853_v24 = vpack.c.bf16 %v2835_v23, %v2835_v23 }
 0xdf3   : > { %2910 = vmatmul.bf16.vlgmr.msrb.gmra.mxu0 %v2853_v24 }
 0xe70   : > { %v2911_v47 = vpop.f32.mrf.mxu0 }
 0xe71   : > { %v2912_v29 = vadd.f32 %v2911_v47, %v2852_v28 }
 0xe73   : > { %4328 = vtanh.f32 %v2912_v29 }
 0xe78   : > { %v2913_v30 = vpop.f32.mrf.mxu0 }
 0xe79   : > { %v4329_v31 = vpop.eup %4328 }
 0xe7a   : > { %v2933_v32 = vpack.c.bf16 %v4329_v31, %v4329_v31 }
 0xe7c   : > { %2990 = vmatmul.bf16.vlgmr.msrb.gmra.mxu1 %v2933_v32 }
 0xef9   : > { %v2991_v34 = vpop.f32.mrf.mxu1 }
 0xefa   : > { %v2992_v35 = vadd.f32 %v2991_v34, %v2932_v33 }
 0xefc   : > { %2995 = vst [vmem:[%s630_s27] sm:$0x1] %v2992_v35 }
 0xefd   : > { %4357 = shalt.err (!%p4354_p3)
}
 0xefe   : > { %4225 = dma.vmem_to_hbm [thread:$0]  (%p4538_p5), %s3008_s23, 16, %s3010_s3, %s2997_s5  }
 0xf01   : > { %v2993_v36 = vpop.f32.mrf.mxu1 }
 0xf02 PF: > { %s5508_s28 = sld [smem:[#allocation7_spill]] }
 0xf03   : > { %s5509_s0 = sld [smem:[#allocation5_spill]] }
 0xf08   : > { %p4231_p4 = scmp.ge.s32.totalorder %s5508_s28, 2 }
 0xf09   : > { %s3021_s30 = sand.u32 1, %s5509_s0  }
 0xf0a   : > { %p4228_p7 = pnand %p4231_p4, %p4542_p6  ;;  %s3022_s27 = scalar_lea.sflag [#allocation3], %s3021_s30 }
 0xf0c   : > { %p4229_p8 = pneg %p4228_p7 }
 0xf0e   : > { %4375 = dma.done.wait (%p4229_p8), %s3022_s27, 16  }
 0xf0f   : > { %4377 = vsyncadd (%p4229_p8), %s3022_s27, 4294967280  ;;  %s5511_s24 = sld [smem:[#allocation8_spill]]  ;;  %s5514_s1 = smov %s4384_s22 }
 0xf10   : > { %s5512_s6 = sld [smem:[#allocation6_spill]] }
 0xf11   : > { %s5513_s23 = sld [smem:[#allocation9_spill]] }
 0xf15   : > { %p30_p9 = scmp.ge.s32.totalorder %s5511_s24, 4  }
 0xf16   : > { %s5515_s22 = smov %s5512_s6 }
 0xf17   :  { %32 = sbr.rel (!%p30_p9) target bundleno = 14 (0xe), region = 150 }
 0xf1c   :  { %3027 = vsyncpa [#allocation3], 1 }
 0xf1d   :  { %3029 = vsyncpa [#allocation3 + $0x1], 1 }

</bundles_post_ra>
